<compile_context>
chip_gen: v6e
topology: v6e:2x2x1
jax: 0.10.0
libtpu: 0.0.40
codegen_flags: <defaults>
</compile_context>

<pallas_src>
from functools import partial

import numpy as np
import jax
import jax.numpy as jnp
from jax.experimental import pallas as pl
from jax.experimental.pallas import tpu as pltpu

CIN_PAD = 8  # pad the 3 input channels to 8 so each stacked tap piece is a whole f32 vreg row-block


# --------------------------- constants (numpy, built once on host) ---------------------------

def border_masks(H, W, B):
    """(9, 1, B*H*W) 0/1 masks: mask[d, 0, b*HW + y*W + x] = 1 iff neighbour (y+dy, x+dx) is inside
    the image, tap d = (dy+1)*3 + (dx+1).  Tiled over the B images packed along the lane axis."""
    m = np.zeros((9, H * W), np.float32)
    for d in range(9):
        dy, dx = d // 3 - 1, d % 3 - 1
        for y in range(H):
            for x in range(W):
                if 0 <= y + dy < H and 0 <= x + dx < W:
                    m[d, y * W + x] = 1.0
    return np.tile(m, (1, B)).reshape(9, 1, B * H * W)


def pool_select_block(H, W, B):
    """(B*H*W, B*H*W/4) block-diagonal 0/1 matrix: picks the top-left of every 2x2 window per batch
    (stride-2 down-select) and packs the B pooled images side-by-side on the lane axis."""
    Ho, Wo = H // 2, W // 2
    S = np.zeros((H * W, Ho * Wo), np.float32)
    for yo in range(Ho):
        for xo in range(Wo):
            S[(2 * yo) * W + 2 * xo, yo * Wo + xo] = 1.0
    return np.kron(np.eye(B, dtype=np.float32), S)


def bilinear_matrix(n_in, scale=2):
    """(n_out, n_in) 1-D bilinear interpolation matrix, torch align_corners=False."""
    n_out = n_in * scale
    M = np.zeros((n_out, n_in), np.float32)
    for o in range(n_out):
        src = (o + 0.5) / scale - 0.5
        src = min(max(src, 0.0), float(n_in - 1))
        i0 = int(np.floor(src))
        i1 = min(i0 + 1, n_in - 1)
        w = src - i0
        M[o, i0] += 1.0 - w
        M[o, i1] += w
    return M


def upsample_block(Hp, Wp, B, scale=2):
    """(B*Hp*Wp, B*(2Hp)*(2Wp)) block-diag separable bilinear x2 upsample:  x4 = x3 @ U."""
    U = np.kron(bilinear_matrix(Hp, scale), bilinear_matrix(Wp, scale)).T.astype(np.float32)
    return np.kron(np.eye(B, dtype=np.float32), U)


def build_consts(B, H, W):
    Hp, Wp = H // 2, W // 2
    return {
        "m1": jnp.asarray(border_masks(H, W, B), jnp.float32),
        "m2": jnp.asarray(border_masks(Hp, Wp, B), jnp.float32),
        "sel": jnp.asarray(pool_select_block(H, W, B), jnp.bfloat16),   # 0/1 -> exact in bf16
        "up": jnp.asarray(upsample_block(Hp, Wp, B), jnp.bfloat16),     # {1,.75,.5625,...} -> exact
    }


# ----------------------------------- parameters (torch layout) -----------------------------------

def init_params(key):
    k = jax.random.split(key, 6)
    # PyTorch Conv2d layout: OIHW weights + per-channel bias (synthetic deterministic init)
    return {
        "w1": jax.random.normal(k[0], (16, 3, 3, 3), jnp.float32) * 0.1,
        "b1": jax.random.normal(k[1], (16,), jnp.float32) * 0.1,
        "w2": jax.random.normal(k[2], (32, 16, 3, 3), jnp.float32) * 0.1,
        "b2": jax.random.normal(k[3], (32,), jnp.float32) * 0.1,
        "w3": jax.random.normal(k[4], (1, 32, 1, 1), jnp.float32) * 0.1,
        "b3": jax.random.normal(k[5], (1,), jnp.float32) * 0.1,
    }


def pack_params(p):
    """OIHW conv weights -> (Cout, 9*Cin) tap-stacked bf16 GEMM weights; tap d = ky*3+kx, row index
    d*Cin + c (Cin padded to CIN_PAD for conv1, matching the stacked-tap activation layout)."""
    w1 = np.transpose(np.asarray(p["w1"], np.float32), (0, 2, 3, 1)).reshape(16, 9, 3)
    w1p = np.zeros((16, 9, CIN_PAD), np.float32)
    w1p[:, :, :3] = w1
    w2 = np.transpose(np.asarray(p["w2"], np.float32), (0, 2, 3, 1)).reshape(32, 9 * 16)
    return {
        "w1": jnp.asarray(w1p.reshape(16, 9 * CIN_PAD), jnp.bfloat16),
        "b1": jnp.asarray(np.asarray(p["b1"], np.float32).reshape(16, 1)),
        "w2": jnp.asarray(w2, jnp.bfloat16),
        "b2": jnp.asarray(np.asarray(p["b2"], np.float32).reshape(32, 1)),
        "w3": jnp.asarray(np.asarray(p["w3"], np.float32).reshape(1, 32), jnp.bfloat16),
        "b3": jnp.asarray(np.asarray(p["b3"], np.float32).reshape(1)),
    }


# ------------------------------------ fused Pallas kernel ------------------------------------

def _unet_kernel(x_ref, m1_ref, w1_ref, b1_ref, sel_ref, m2_ref, w2_ref, b2_ref,
                 up_ref, w3_ref, b3_ref, o_ref, *, H, W, B):
    f32, bf16 = jnp.float32, jnp.bfloat16
    L = B * H * W                          # full-res lanes (batch folded onto the lane axis)
    Hp, Wp = H // 2, W // 2
    L2 = B * Hp * Wp                       # pooled lanes (B*64 = 128 -> lane-dense interior)

    def conv3x3_taps(a, w_img, n_lanes, mask_ref):
        """Stack the 9 shifted taps of `a` (C, n_lanes) via XLU lane rolls + 0/1 border masks.
        Row/batch wrap positions produced by the roll are exactly the masked-out ones."""
        taps = []
        for d in range(9):
            dy, dx = d // 3 - 1, d % 3 - 1
            off = dy * w_img + dx
            t = pltpu.roll(a, shift=(-off) % n_lanes, axis=1) if off != 0 else a
            taps.append(t * mask_ref[d])                       # (C, n_lanes) * (1, n_lanes)
        return jnp.concatenate(taps, axis=0)                   # (9*C, n_lanes), f32

    # ---- conv1 3x3 pad=1 + ReLU: ONE (16, 72) x (72, L) bf16 MXU GEMM, f32 accumulation
    x = x_ref[...]                                             # (CIN_PAD, L) f32
    x9 = conv3x3_taps(x, W, L, m1_ref).astype(bf16)
    x1 = jnp.maximum(jnp.dot(w1_ref[...], x9, preferred_element_type=f32) + b1_ref[...], 0.0)

    # ---- 2x2 max-pool stride 2: 3 neighbour rolls + max, then block-diag 0/1 down-select GEMM.
    # Wrapped lanes only ever land on odd rows/cols, which the select matrix never reads.
    n01 = pltpu.roll(x1, shift=(-1) % L, axis=1)
    n10 = pltpu.roll(x1, shift=(-W) % L, axis=1)
    n11 = pltpu.roll(x1, shift=(-(W + 1)) % L, axis=1)
    m = jnp.maximum(jnp.maximum(x1, n01), jnp.maximum(n10, n11))
    x2 = jnp.dot(m.astype(bf16), sel_ref[...], preferred_element_type=f32)   # (16, L2)

    # ---- conv2 3x3 pad=1 + ReLU on the pooled grid: ONE (32, 144) x (144, L2) GEMM
    x9b = conv3x3_taps(x2, Wp, L2, m2_ref).astype(bf16)
    x3 = jnp.maximum(jnp.dot(w2_ref[...], x9b, preferred_element_type=f32) + b2_ref[...], 0.0)

    # ---- bilinear x2 upsample (align_corners=False): one block-diag lane-dense GEMM -> (32, L)
    x4 = jnp.dot(x3.astype(bf16), up_ref[...], preferred_element_type=f32)

    # ---- conv3 1x1 + numerically stable sigmoid (single shared EUP reciprocal); scalar bias: SMEM
    logits = jnp.dot(w3_ref[...], x4.astype(bf16), preferred_element_type=f32) + b3_ref[0]
    z = jnp.exp(-jnp.abs(logits))
    inv = pl.reciprocal(1.0 + z, approx=True)
    o_ref[...] = jnp.where(logits >= 0.0, inv, z * inv)


# --------------------------------------- host wrapper ---------------------------------------

@jax.jit
def simple_unet_forward(x_nchw, kp, consts):
    B, Cin, H, W = x_nchw.shape
    HW, L = H * W, B * H * W
    L2 = B * (H // 2) * (W // 2)

    # NCHW -> channels-on-sublane, (batch*spatial)-on-lane; pad Cin 3 -> 8 for tap alignment
    xf = jnp.transpose(x_nchw.reshape(B, Cin, HW), (1, 0, 2)).reshape(Cin, L).astype(jnp.float32)
    xf = jnp.pad(xf, ((0, CIN_PAD - Cin), (0, 0)))

    out = pl.pallas_call(
        partial(_unet_kernel, H=H, W=W, B=B),
        out_shape=jax.ShapeDtypeStruct((1, L), jnp.float32),
        grid=(1,),                                               # single step: constants DMAed once
        in_specs=[
            pl.BlockSpec((CIN_PAD, L), lambda i: (0, 0)),        # x, channels x (batch*spatial)
            pl.BlockSpec((9, 1, L), lambda i: (0, 0, 0)),        # conv1 border masks
            pl.BlockSpec((16, 9 * CIN_PAD), lambda i: (0, 0)),   # conv1 tap-stacked weights (bf16)
            pl.BlockSpec((16, 1), lambda i: (0, 0)),             # conv1 bias
            pl.BlockSpec((L, L2), lambda i: (0, 0)),             # pool block-diag select (bf16)
            pl.BlockSpec((9, 1, L2), lambda i: (0, 0, 0)),       # conv2 border masks
            pl.BlockSpec((32, 9 * 16), lambda i: (0, 0)),        # conv2 tap-stacked weights (bf16)
            pl.BlockSpec((32, 1), lambda i: (0, 0)),             # conv2 bias
            pl.BlockSpec((L2, L), lambda i: (0, 0)),             # bilinear block-diag upsample (bf16)
            pl.BlockSpec((1, 32), lambda i: (0, 0)),             # conv3 weight (bf16)
            pl.BlockSpec(memory_space=pltpu.MemorySpace.SMEM),   # conv3 scalar bias
        ],
        out_specs=pl.BlockSpec((1, L), lambda i: (0, 0)),        # lane-dense (B*H*W wide) output
    )(xf, consts["m1"], kp["w1"], kp["b1"], consts["sel"],
      consts["m2"], kp["w2"], kp["b2"], consts["up"], kp["w3"], kp["b3"])

    return out.reshape(B, 1, H, W)


# --------------------------------- pure-JAX reference (no Pallas) ---------------------------------

def ref_forward(x, p, H, W):
    dn = ("NCHW", "OIHW", "NCHW")
    y = jax.lax.conv_general_dilated(x, p["w1"], (1, 1), "SAME", dimension_numbers=dn)
    y = jax.nn.relu(y + p["b1"][None, :, None, None])
    y = jax.lax.reduce_window(y, -jnp.inf, jax.lax.max, (1, 1, 2, 2), (1, 1, 2, 2), "VALID")
    y = jax.lax.conv_general_dilated(y, p["w2"], (1, 1), "SAME", dimension_numbers=dn)
    y = jax.nn.relu(y + p["b2"][None, :, None, None])
    Mh = jnp.asarray(bilinear_matrix(H // 2))
    Mw = jnp.asarray(bilinear_matrix(W // 2))
    y = jnp.einsum("oh,bchw->bcow", Mh, y)
    y = jnp.einsum("pw,bchw->bchp", Mw, y)
    y = jax.lax.conv_general_dilated(y, p["w3"], (1, 1), "VALID", dimension_numbers=dn)
    return jax.nn.sigmoid(y + p["b3"][None, :, None, None])


# -------------------------------------------- main --------------------------------------------

if __name__ == "__main__":
    key = jax.random.PRNGKey(0)
    kx, kp_key = jax.random.split(key)
    B, C, H, W = 2, 3, 16, 16
    x = jax.random.normal(kx, (B, C, H, W), jnp.float32)       # NCHW, matches Conv2d(3, ...)

    params = init_params(kp_key)
    kparams = pack_params(params)
    consts = build_consts(B, H, W)

    out = simple_unet_forward(x, kparams, consts)
    out = jax.block_until_ready(out)

    assert out.shape == (B, 1, H, W)
    assert bool(jnp.all(jnp.isfinite(out)))
    assert bool(jnp.all((out > 0.0) & (out < 1.0)))            # sigmoid range

    # correctness vs. a pure-JAX/XLA reference of the same torch module (tolerance covers
    # bf16 MXU operands + approx reciprocal; structural errors would be orders larger)
    ref = ref_forward(x, params, H, W)
    max_err = float(jnp.max(jnp.abs(out - ref)))
    assert max_err < 1e-2, f"mismatch vs reference: {max_err}"

    print("KERNEL_OK")
</pallas_src>

<mosaic_0001>
module attributes {stable_mosaic.version = 11 : i64} {
  func.func @_unet_kernel(%arg0: i32, %arg1: memref<8x512xf32, #tpu.memory_space<vmem>>, %arg2: memref<9x1x512xf32, #tpu.memory_space<vmem>>, %arg3: memref<16x72xbf16, #tpu.memory_space<vmem>>, %arg4: memref<16x1xf32, #tpu.memory_space<vmem>>, %arg5: memref<512x128xbf16, #tpu.memory_space<vmem>>, %arg6: memref<9x1x128xf32, #tpu.memory_space<vmem>>, %arg7: memref<32x144xbf16, #tpu.memory_space<vmem>>, %arg8: memref<32x1xf32, #tpu.memory_space<vmem>>, %arg9: memref<128x512xbf16, #tpu.memory_space<vmem>>, %arg10: memref<1x32xbf16, #tpu.memory_space<vmem>>, %arg11: memref<1xf32, #tpu.memory_space<smem>>, %arg12: memref<1x512xf32, #tpu.memory_space<vmem>>) attributes {dimension_semantics = [#tpu.dimension_semantics<arbitrary>], iteration_bounds = array<i64: 1>, scalar_prefetch = 0 : i64, scratch_operands = 0 : i64, tpu.core_type = #tpu.core_type<tc>, window_params = [{pipeline_mode = #tpu.pipeline_mode<synchronous>, transform_indices = @transform_0, window_bounds = array<i64: 8, 512>}, {pipeline_mode = #tpu.pipeline_mode<synchronous>, transform_indices = @transform_1, window_bounds = array<i64: 9, 1, 512>}, {pipeline_mode = #tpu.pipeline_mode<synchronous>, transform_indices = @transform_2, window_bounds = array<i64: 16, 72>}, {pipeline_mode = #tpu.pipeline_mode<synchronous>, transform_indices = @transform_3, window_bounds = array<i64: 16, 1>}, {pipeline_mode = #tpu.pipeline_mode<synchronous>, transform_indices = @transform_4, window_bounds = array<i64: 512, 128>}, {pipeline_mode = #tpu.pipeline_mode<synchronous>, transform_indices = @transform_5, window_bounds = array<i64: 9, 1, 128>}, {pipeline_mode = #tpu.pipeline_mode<synchronous>, transform_indices = @transform_6, window_bounds = array<i64: 32, 144>}, {pipeline_mode = #tpu.pipeline_mode<synchronous>, transform_indices = @transform_7, window_bounds = array<i64: 32, 1>}, {pipeline_mode = #tpu.pipeline_mode<synchronous>, transform_indices = @transform_8, window_bounds = array<i64: 128, 512>}, {pipeline_mode = #tpu.pipeline_mode<synchronous>, transform_indices = @transform_9, window_bounds = array<i64: 1, 32>}, {transform_indices = @transform_10, window_bounds = array<i64: 1>}, {pipeline_mode = #tpu.pipeline_mode<synchronous>, transform_indices = @transform_11, window_bounds = array<i64: 1, 512>}]} {
    %c0 = arith.constant 0 : index
    %c0_0 = arith.constant 0 : index
    %0 = vector.load %arg1[%c0, %c0_0] : memref<8x512xf32, #tpu.memory_space<vmem>>, vector<8x512xf32>
    %c17_i32 = arith.constant 17 : i32
    %1 = tpu.dynamic_rotate %0 by %c17_i32 dim 1 : vector<8x512xf32>, i32 -> vector<8x512xf32>
    %c0_1 = arith.constant 0 : index
    %c0_2 = arith.constant 0 : index
    %c0_3 = arith.constant 0 : index
    %2 = vector.load %arg2[%c0_1, %c0_2, %c0_3] : memref<9x1x512xf32, #tpu.memory_space<vmem>>, vector<1x1x512xf32>
    %3 = vector.shape_cast %2 : vector<1x1x512xf32> to vector<1x512xf32>
    %4 = vector.broadcast %3 : vector<1x512xf32> to vector<8x512xf32>
    %5 = arith.mulf %1, %4 : vector<8x512xf32>
    %c16_i32 = arith.constant 16 : i32
    %6 = tpu.dynamic_rotate %0 by %c16_i32 dim 1 : vector<8x512xf32>, i32 -> vector<8x512xf32>
    %c1 = arith.constant 1 : index
    %c0_4 = arith.constant 0 : index
    %c0_5 = arith.constant 0 : index
    %7 = vector.load %arg2[%c1, %c0_4, %c0_5] : memref<9x1x512xf32, #tpu.memory_space<vmem>>, vector<1x1x512xf32>
    %8 = vector.shape_cast %7 : vector<1x1x512xf32> to vector<1x512xf32>
    %9 = vector.broadcast %8 : vector<1x512xf32> to vector<8x512xf32>
    %10 = arith.mulf %6, %9 : vector<8x512xf32>
    %c15_i32 = arith.constant 15 : i32
    %11 = tpu.dynamic_rotate %0 by %c15_i32 dim 1 : vector<8x512xf32>, i32 -> vector<8x512xf32>
    %c2 = arith.constant 2 : index
    %c0_6 = arith.constant 0 : index
    %c0_7 = arith.constant 0 : index
    %12 = vector.load %arg2[%c2, %c0_6, %c0_7] : memref<9x1x512xf32, #tpu.memory_space<vmem>>, vector<1x1x512xf32>
    %13 = vector.shape_cast %12 : vector<1x1x512xf32> to vector<1x512xf32>
    %14 = vector.broadcast %13 : vector<1x512xf32> to vector<8x512xf32>
    %15 = arith.mulf %11, %14 : vector<8x512xf32>
    %c1_i32 = arith.constant 1 : i32
    %16 = tpu.dynamic_rotate %0 by %c1_i32 dim 1 : vector<8x512xf32>, i32 -> vector<8x512xf32>
    %c3 = arith.constant 3 : index
    %c0_8 = arith.constant 0 : index
    %c0_9 = arith.constant 0 : index
    %17 = vector.load %arg2[%c3, %c0_8, %c0_9] : memref<9x1x512xf32, #tpu.memory_space<vmem>>, vector<1x1x512xf32>
    %18 = vector.shape_cast %17 : vector<1x1x512xf32> to vector<1x512xf32>
    %19 = vector.broadcast %18 : vector<1x512xf32> to vector<8x512xf32>
    %20 = arith.mulf %16, %19 : vector<8x512xf32>
    %c4 = arith.constant 4 : index
    %c0_10 = arith.constant 0 : index
    %c0_11 = arith.constant 0 : index
    %21 = vector.load %arg2[%c4, %c0_10, %c0_11] : memref<9x1x512xf32, #tpu.memory_space<vmem>>, vector<1x1x512xf32>
    %22 = vector.shape_cast %21 : vector<1x1x512xf32> to vector<1x512xf32>
    %23 = vector.broadcast %22 : vector<1x512xf32> to vector<8x512xf32>
    %24 = arith.mulf %0, %23 : vector<8x512xf32>
    %c511_i32 = arith.constant 511 : i32
    %25 = tpu.dynamic_rotate %0 by %c511_i32 dim 1 : vector<8x512xf32>, i32 -> vector<8x512xf32>
    %c5 = arith.constant 5 : index
    %c0_12 = arith.constant 0 : index
    %c0_13 = arith.constant 0 : index
    %26 = vector.load %arg2[%c5, %c0_12, %c0_13] : memref<9x1x512xf32, #tpu.memory_space<vmem>>, vector<1x1x512xf32>
    %27 = vector.shape_cast %26 : vector<1x1x512xf32> to vector<1x512xf32>
    %28 = vector.broadcast %27 : vector<1x512xf32> to vector<8x512xf32>
    %29 = arith.mulf %25, %28 : vector<8x512xf32>
    %c497_i32 = arith.constant 497 : i32
    %30 = tpu.dynamic_rotate %0 by %c497_i32 dim 1 : vector<8x512xf32>, i32 -> vector<8x512xf32>
    %c6 = arith.constant 6 : index
    %c0_14 = arith.constant 0 : index
    %c0_15 = arith.constant 0 : index
    %31 = vector.load %arg2[%c6, %c0_14, %c0_15] : memref<9x1x512xf32, #tpu.memory_space<vmem>>, vector<1x1x512xf32>
    %32 = vector.shape_cast %31 : vector<1x1x512xf32> to vector<1x512xf32>
    %33 = vector.broadcast %32 : vector<1x512xf32> to vector<8x512xf32>
    %34 = arith.mulf %30, %33 : vector<8x512xf32>
    %c496_i32 = arith.constant 496 : i32
    %35 = tpu.dynamic_rotate %0 by %c496_i32 dim 1 : vector<8x512xf32>, i32 -> vector<8x512xf32>
    %c7 = arith.constant 7 : index
    %c0_16 = arith.constant 0 : index
    %c0_17 = arith.constant 0 : index
    %36 = vector.load %arg2[%c7, %c0_16, %c0_17] : memref<9x1x512xf32, #tpu.memory_space<vmem>>, vector<1x1x512xf32>
    %37 = vector.shape_cast %36 : vector<1x1x512xf32> to vector<1x512xf32>
    %38 = vector.broadcast %37 : vector<1x512xf32> to vector<8x512xf32>
    %39 = arith.mulf %35, %38 : vector<8x512xf32>
    %c495_i32 = arith.constant 495 : i32
    %40 = tpu.dynamic_rotate %0 by %c495_i32 dim 1 : vector<8x512xf32>, i32 -> vector<8x512xf32>
    %c8 = arith.constant 8 : index
    %c0_18 = arith.constant 0 : index
    %c0_19 = arith.constant 0 : index
    %41 = vector.load %arg2[%c8, %c0_18, %c0_19] : memref<9x1x512xf32, #tpu.memory_space<vmem>>, vector<1x1x512xf32>
    %42 = vector.shape_cast %41 : vector<1x1x512xf32> to vector<1x512xf32>
    %43 = vector.broadcast %42 : vector<1x512xf32> to vector<8x512xf32>
    %44 = arith.mulf %40, %43 : vector<8x512xf32>
    %45 = tpu.concatenate %5, %10, %15, %20, %24, %29, %34, %39, %44 in 0 : vector<8x512xf32>, vector<8x512xf32>, vector<8x512xf32>, vector<8x512xf32>, vector<8x512xf32>, vector<8x512xf32>, vector<8x512xf32>, vector<8x512xf32>, vector<8x512xf32> -> vector<72x512xf32>
    %46 = arith.truncf %45 : vector<72x512xf32> to vector<72x512xbf16>
    %c0_20 = arith.constant 0 : index
    %c0_21 = arith.constant 0 : index
    %47 = vector.load %arg3[%c0_20, %c0_21] : memref<16x72xbf16, #tpu.memory_space<vmem>>, vector<16x72xbf16>
    %cst = arith.constant dense<0.000000e+00> : vector<16x512xf32>
    %48 = tpu.matmul %47, %46, %cst {dimension_numbers = #tpu.dot_dimension_numbers<[1], [0], [0], [1], [0, 0, 1, 1], [], []>} : vector<16x72xbf16>, vector<72x512xbf16>, vector<16x512xf32> -> vector<16x512xf32>
    %c0_22 = arith.constant 0 : index
    %c0_23 = arith.constant 0 : index
    %49 = vector.load %arg4[%c0_22, %c0_23] : memref<16x1xf32, #tpu.memory_space<vmem>>, vector<16x1xf32>
    %50 = vector.broadcast %49 : vector<16x1xf32> to vector<16x512xf32>
    %51 = arith.addf %48, %50 : vector<16x512xf32>
    %cst_24 = arith.constant 0.000000e+00 : f32
    %52 = vector.broadcast %cst_24 : f32 to vector<16x512xf32>
    %53 = arith.maximumf %51, %52 : vector<16x512xf32>
    %c511_i32_25 = arith.constant 511 : i32
    %54 = tpu.dynamic_rotate %53 by %c511_i32_25 dim 1 : vector<16x512xf32>, i32 -> vector<16x512xf32>
    %c496_i32_26 = arith.constant 496 : i32
    %55 = tpu.dynamic_rotate %53 by %c496_i32_26 dim 1 : vector<16x512xf32>, i32 -> vector<16x512xf32>
    %c495_i32_27 = arith.constant 495 : i32
    %56 = tpu.dynamic_rotate %53 by %c495_i32_27 dim 1 : vector<16x512xf32>, i32 -> vector<16x512xf32>
    %57 = arith.maximumf %53, %54 : vector<16x512xf32>
    %58 = arith.maximumf %55, %56 : vector<16x512xf32>
    %59 = arith.maximumf %57, %58 : vector<16x512xf32>
    %60 = arith.truncf %59 : vector<16x512xf32> to vector<16x512xbf16>
    %c0_28 = arith.constant 0 : index
    %c0_29 = arith.constant 0 : index
    %61 = vector.load %arg5[%c0_28, %c0_29] : memref<512x128xbf16, #tpu.memory_space<vmem>>, vector<512x128xbf16>
    %cst_30 = arith.constant dense<0.000000e+00> : vector<16x128xf32>
    %62 = tpu.matmul %60, %61, %cst_30 {dimension_numbers = #tpu.dot_dimension_numbers<[1], [0], [0], [1], [0, 0, 1, 1], [], []>} : vector<16x512xbf16>, vector<512x128xbf16>, vector<16x128xf32> -> vector<16x128xf32>
    %c9_i32 = arith.constant 9 : i32
    %63 = tpu.dynamic_rotate %62 by %c9_i32 dim 1 : vector<16x128xf32>, i32 -> vector<16x128xf32>
    %c0_31 = arith.constant 0 : index
    %c0_32 = arith.constant 0 : index
    %c0_33 = arith.constant 0 : index
    %64 = vector.load %arg6[%c0_31, %c0_32, %c0_33] : memref<9x1x128xf32, #tpu.memory_space<vmem>>, vector<1x1x128xf32>
    %65 = vector.shape_cast %64 : vector<1x1x128xf32> to vector<1x128xf32>
    %66 = vector.broadcast %65 : vector<1x128xf32> to vector<16x128xf32>
    %67 = arith.mulf %63, %66 : vector<16x128xf32>
    %c8_i32 = arith.constant 8 : i32
    %68 = tpu.dynamic_rotate %62 by %c8_i32 dim 1 : vector<16x128xf32>, i32 -> vector<16x128xf32>
    %c1_34 = arith.constant 1 : index
    %c0_35 = arith.constant 0 : index
    %c0_36 = arith.constant 0 : index
    %69 = vector.load %arg6[%c1_34, %c0_35, %c0_36] : memref<9x1x128xf32, #tpu.memory_space<vmem>>, vector<1x1x128xf32>
    %70 = vector.shape_cast %69 : vector<1x1x128xf32> to vector<1x128xf32>
    %71 = vector.broadcast %70 : vector<1x128xf32> to vector<16x128xf32>
    %72 = arith.mulf %68, %71 : vector<16x128xf32>
    %c7_i32 = arith.constant 7 : i32
    %73 = tpu.dynamic_rotate %62 by %c7_i32 dim 1 : vector<16x128xf32>, i32 -> vector<16x128xf32>
    %c2_37 = arith.constant 2 : index
    %c0_38 = arith.constant 0 : index
    %c0_39 = arith.constant 0 : index
    %74 = vector.load %arg6[%c2_37, %c0_38, %c0_39] : memref<9x1x128xf32, #tpu.memory_space<vmem>>, vector<1x1x128xf32>
    %75 = vector.shape_cast %74 : vector<1x1x128xf32> to vector<1x128xf32>
    %76 = vector.broadcast %75 : vector<1x128xf32> to vector<16x128xf32>
    %77 = arith.mulf %73, %76 : vector<16x128xf32>
    %c1_i32_40 = arith.constant 1 : i32
    %78 = tpu.dynamic_rotate %62 by %c1_i32_40 dim 1 : vector<16x128xf32>, i32 -> vector<16x128xf32>
    %c3_41 = arith.constant 3 : index
    %c0_42 = arith.constant 0 : index
    %c0_43 = arith.constant 0 : index
    %79 = vector.load %arg6[%c3_41, %c0_42, %c0_43] : memref<9x1x128xf32, #tpu.memory_space<vmem>>, vector<1x1x128xf32>
    %80 = vector.shape_cast %79 : vector<1x1x128xf32> to vector<1x128xf32>
    %81 = vector.broadcast %80 : vector<1x128xf32> to vector<16x128xf32>
    %82 = arith.mulf %78, %81 : vector<16x128xf32>
    %c4_44 = arith.constant 4 : index
    %c0_45 = arith.constant 0 : index
    %c0_46 = arith.constant 0 : index
    %83 = vector.load %arg6[%c4_44, %c0_45, %c0_46] : memref<9x1x128xf32, #tpu.memory_space<vmem>>, vector<1x1x128xf32>
    %84 = vector.shape_cast %83 : vector<1x1x128xf32> to vector<1x128xf32>
    %85 = vector.broadcast %84 : vector<1x128xf32> to vector<16x128xf32>
    %86 = arith.mulf %62, %85 : vector<16x128xf32>
    %c127_i32 = arith.constant 127 : i32
    %87 = tpu.dynamic_rotate %62 by %c127_i32 dim 1 : vector<16x128xf32>, i32 -> vector<16x128xf32>
    %c5_47 = arith.constant 5 : index
    %c0_48 = arith.constant 0 : index
    %c0_49 = arith.constant 0 : index
    %88 = vector.load %arg6[%c5_47, %c0_48, %c0_49] : memref<9x1x128xf32, #tpu.memory_space<vmem>>, vector<1x1x128xf32>
    %89 = vector.shape_cast %88 : vector<1x1x128xf32> to vector<1x128xf32>
    %90 = vector.broadcast %89 : vector<1x128xf32> to vector<16x128xf32>
    %91 = arith.mulf %87, %90 : vector<16x128xf32>
    %c121_i32 = arith.constant 121 : i32
    %92 = tpu.dynamic_rotate %62 by %c121_i32 dim 1 : vector<16x128xf32>, i32 -> vector<16x128xf32>
    %c6_50 = arith.constant 6 : index
    %c0_51 = arith.constant 0 : index
    %c0_52 = arith.constant 0 : index
    %93 = vector.load %arg6[%c6_50, %c0_51, %c0_52] : memref<9x1x128xf32, #tpu.memory_space<vmem>>, vector<1x1x128xf32>
    %94 = vector.shape_cast %93 : vector<1x1x128xf32> to vector<1x128xf32>
    %95 = vector.broadcast %94 : vector<1x128xf32> to vector<16x128xf32>
    %96 = arith.mulf %92, %95 : vector<16x128xf32>
    %c120_i32 = arith.constant 120 : i32
    %97 = tpu.dynamic_rotate %62 by %c120_i32 dim 1 : vector<16x128xf32>, i32 -> vector<16x128xf32>
    %c7_53 = arith.constant 7 : index
    %c0_54 = arith.constant 0 : index
    %c0_55 = arith.constant 0 : index
    %98 = vector.load %arg6[%c7_53, %c0_54, %c0_55] : memref<9x1x128xf32, #tpu.memory_space<vmem>>, vector<1x1x128xf32>
    %99 = vector.shape_cast %98 : vector<1x1x128xf32> to vector<1x128xf32>
    %100 = vector.broadcast %99 : vector<1x128xf32> to vector<16x128xf32>
    %101 = arith.mulf %97, %100 : vector<16x128xf32>
    %c119_i32 = arith.constant 119 : i32
    %102 = tpu.dynamic_rotate %62 by %c119_i32 dim 1 : vector<16x128xf32>, i32 -> vector<16x128xf32>
    %c8_56 = arith.constant 8 : index
    %c0_57 = arith.constant 0 : index
    %c0_58 = arith.constant 0 : index
    %103 = vector.load %arg6[%c8_56, %c0_57, %c0_58] : memref<9x1x128xf32, #tpu.memory_space<vmem>>, vector<1x1x128xf32>
    %104 = vector.shape_cast %103 : vector<1x1x128xf32> to vector<1x128xf32>
    %105 = vector.broadcast %104 : vector<1x128xf32> to vector<16x128xf32>
    %106 = arith.mulf %102, %105 : vector<16x128xf32>
    %107 = tpu.concatenate %67, %72, %77, %82, %86, %91, %96, %101, %106 in 0 : vector<16x128xf32>, vector<16x128xf32>, vector<16x128xf32>, vector<16x128xf32>, vector<16x128xf32>, vector<16x128xf32>, vector<16x128xf32>, vector<16x128xf32>, vector<16x128xf32> -> vector<144x128xf32>
    %108 = arith.truncf %107 : vector<144x128xf32> to vector<144x128xbf16>
    %c0_59 = arith.constant 0 : index
    %c0_60 = arith.constant 0 : index
    %109 = vector.load %arg7[%c0_59, %c0_60] : memref<32x144xbf16, #tpu.memory_space<vmem>>, vector<32x144xbf16>
    %cst_61 = arith.constant dense<0.000000e+00> : vector<32x128xf32>
    %110 = tpu.matmul %109, %108, %cst_61 {dimension_numbers = #tpu.dot_dimension_numbers<[1], [0], [0], [1], [0, 0, 1, 1], [], []>} : vector<32x144xbf16>, vector<144x128xbf16>, vector<32x128xf32> -> vector<32x128xf32>
    %c0_62 = arith.constant 0 : index
    %c0_63 = arith.constant 0 : index
    %111 = vector.load %arg8[%c0_62, %c0_63] : memref<32x1xf32, #tpu.memory_space<vmem>>, vector<32x1xf32>
    %112 = vector.broadcast %111 : vector<32x1xf32> to vector<32x128xf32>
    %113 = arith.addf %110, %112 : vector<32x128xf32>
    %cst_64 = arith.constant 0.000000e+00 : f32
    %114 = vector.broadcast %cst_64 : f32 to vector<32x128xf32>
    %115 = arith.maximumf %113, %114 : vector<32x128xf32>
    %116 = arith.truncf %115 : vector<32x128xf32> to vector<32x128xbf16>
    %c0_65 = arith.constant 0 : index
    %c0_66 = arith.constant 0 : index
    %117 = vector.load %arg9[%c0_65, %c0_66] : memref<128x512xbf16, #tpu.memory_space<vmem>>, vector<128x512xbf16>
    %cst_67 = arith.constant dense<0.000000e+00> : vector<32x512xf32>
    %118 = tpu.matmul %116, %117, %cst_67 {dimension_numbers = #tpu.dot_dimension_numbers<[1], [0], [0], [1], [0, 0, 1, 1], [], []>} : vector<32x128xbf16>, vector<128x512xbf16>, vector<32x512xf32> -> vector<32x512xf32>
    %c0_68 = arith.constant 0 : index
    %c0_69 = arith.constant 0 : index
    %119 = vector.load %arg10[%c0_68, %c0_69] : memref<1x32xbf16, #tpu.memory_space<vmem>>, vector<1x32xbf16>
    %120 = arith.truncf %118 : vector<32x512xf32> to vector<32x512xbf16>
    %cst_70 = arith.constant dense<0.000000e+00> : vector<1x512xf32>
    %121 = tpu.matmul %119, %120, %cst_70 {dimension_numbers = #tpu.dot_dimension_numbers<[1], [0], [0], [1], [0, 0, 1, 1], [], []>} : vector<1x32xbf16>, vector<32x512xbf16>, vector<1x512xf32> -> vector<1x512xf32>
    %c0_71 = arith.constant 0 : index
    %122 = memref.load %arg11[%c0_71] : memref<1xf32, #tpu.memory_space<smem>>
    %123 = vector.broadcast %122 : f32 to vector<1x512xf32>
    %124 = arith.addf %121, %123 : vector<1x512xf32>
    %125 = math.absf %124 : vector<1x512xf32>
    %cst_72 = arith.constant 0.000000e+00 : f32
    %126 = vector.broadcast %cst_72 : f32 to vector<1x512xf32>
    %127 = arith.subf %126, %125 : vector<1x512xf32>
    %128 = math.exp %127 : vector<1x512xf32>
    %cst_73 = arith.constant 1.000000e+00 : f32
    %129 = vector.broadcast %cst_73 : f32 to vector<1x512xf32>
    %130 = arith.addf %129, %128 : vector<1x512xf32>
    %131 = tpu.reciprocal %130 {approx = true} : vector<1x512xf32> -> vector<1x512xf32>
    %cst_74 = arith.constant 0.000000e+00 : f32
    %132 = vector.broadcast %cst_74 : f32 to vector<1x512xf32>
    %133 = arith.cmpf oge, %124, %132 : vector<1x512xf32>
    %134 = arith.mulf %128, %131 : vector<1x512xf32>
    %135 = arith.select %133, %131, %134 : vector<1x512xi1>, vector<1x512xf32>
    %c0_75 = arith.constant 0 : index
    %c0_76 = arith.constant 0 : index
    %136 = vector.load %arg12[%c0_75, %c0_76] : memref<1x512xf32, #tpu.memory_space<vmem>>, vector<1x512xf32>
    tpu.vector_store %arg12[%c0_75, %c0_76], %135 {strides = array<i32>} : memref<1x512xf32, #tpu.memory_space<vmem>>, vector<1x512xf32>,
    return
  }
  func.func @transform_0(%arg0: i32) -> (i32, i32) {
    %c0_i32 = arith.constant 0 : i32
    %c0_i32_0 = arith.constant 0 : i32
    %c0_i32_1 = arith.constant 0 : i32
    return %c0_i32, %c0_i32_0 : i32, i32
  }
  func.func @transform_1(%arg0: i32) -> (i32, i32, i32) {
    %c0_i32 = arith.constant 0 : i32
    %c0_i32_0 = arith.constant 0 : i32
    %c0_i32_1 = arith.constant 0 : i32
    %c0_i32_2 = arith.constant 0 : i32
    return %c0_i32, %c0_i32_0, %c0_i32_1 : i32, i32, i32
  }
  func.func @transform_2(%arg0: i32) -> (i32, i32) {
    %c0_i32 = arith.constant 0 : i32
    %c0_i32_0 = arith.constant 0 : i32
    %c0_i32_1 = arith.constant 0 : i32
    return %c0_i32, %c0_i32_0 : i32, i32
  }
  func.func @transform_3(%arg0: i32) -> (i32, i32) {
    %c0_i32 = arith.constant 0 : i32
    %c0_i32_0 = arith.constant 0 : i32
    %c0_i32_1 = arith.constant 0 : i32
    return %c0_i32, %c0_i32_0 : i32, i32
  }
  func.func @transform_4(%arg0: i32) -> (i32, i32) {
    %c0_i32 = arith.constant 0 : i32
    %c0_i32_0 = arith.constant 0 : i32
    %c0_i32_1 = arith.constant 0 : i32
    return %c0_i32, %c0_i32_0 : i32, i32
  }
  func.func @transform_5(%arg0: i32) -> (i32, i32, i32) {
    %c0_i32 = arith.constant 0 : i32
    %c0_i32_0 = arith.constant 0 : i32
    %c0_i32_1 = arith.constant 0 : i32
    %c0_i32_2 = arith.constant 0 : i32
    return %c0_i32, %c0_i32_0, %c0_i32_1 : i32, i32, i32
  }
  func.func @transform_6(%arg0: i32) -> (i32, i32) {
    %c0_i32 = arith.constant 0 : i32
    %c0_i32_0 = arith.constant 0 : i32
    %c0_i32_1 = arith.constant 0 : i32
    return %c0_i32, %c0_i32_0 : i32, i32
  }
  func.func @transform_7(%arg0: i32) -> (i32, i32) {
    %c0_i32 = arith.constant 0 : i32
    %c0_i32_0 = arith.constant 0 : i32
    %c0_i32_1 = arith.constant 0 : i32
    return %c0_i32, %c0_i32_0 : i32, i32
  }
  func.func @transform_8(%arg0: i32) -> (i32, i32) {
    %c0_i32 = arith.constant 0 : i32
    %c0_i32_0 = arith.constant 0 : i32
    %c0_i32_1 = arith.constant 0 : i32
    return %c0_i32, %c0_i32_0 : i32, i32
  }
  func.func @transform_9(%arg0: i32) -> (i32, i32) {
    %c0_i32 = arith.constant 0 : i32
    %c0_i32_0 = arith.constant 0 : i32
    %c0_i32_1 = arith.constant 0 : i32
    return %c0_i32, %c0_i32_0 : i32, i32
  }
  func.func @transform_10(%arg0: i32) -> i32 {
    %c0_i32 = arith.constant 0 : i32
    %c0_i32_0 = arith.constant 0 : i32
    return %c0_i32 : i32
  }
  func.func @transform_11(%arg0: i32) -> (i32, i32) {
    %c0_i32 = arith.constant 0 : i32
    %c0_i32_0 = arith.constant 0 : i32
    %c0_i32_1 = arith.constant 0 : i32
    return %c0_i32, %c0_i32_0 : i32, i32
  }
}

</mosaic_0001>

<bundles_post_ra>
// kernel: simple_unet_forward.1
= control target key start
LH: loop header
LB: loop body
LE: loop exit
PB: predicated region body
PF: predicated region fallthrough
CT: control target
= control target key end

     0   :  { %17 = vsyncpa [#allocation4], 0  ;;  %s2717_s0 = inlined_call_operand.vmem [shape: f32[8,512], index: 0, kind: input, shape index: {}]   ;;  %s2718_s1 = inlined_call_operand.hbm [shape: f32[9,1,512], index: 1, kind: input, shape index: {}]   ;;  %s2719_s2 = inlined_call_operand.vmem [shape: bf16[16,72], index: 2, kind: input, shape index: {}]   ;;  %s2720_s3 = inlined_call_operand.vmem [shape: f32[16,1], index: 3, kind: input, shape index: {}]   ;;  %s2721_s4 = inlined_call_operand.vmem [shape: bf16[512,128], index: 4, kind: input, shape index: {}]   ;;  %s2722_s5 = inlined_call_operand.vmem [shape: f32[9,1,128], index: 5, kind: input, shape index: {}]   ;;  %s2723_s6 = inlined_call_operand.hbm [shape: bf16[32,144], index: 6, kind: input, shape index: {}]   ;;  %s2724_s7 = inlined_call_operand.vmem [shape: f32[32,1], index: 7, kind: input, shape index: {}]   ;;  %s2725_s8 = inlined_call_operand.hbm [shape: bf16[128,512], index: 8, kind: input, shape index: {}]   ;;  %s2726_s9 = inlined_call_operand.vmem [shape: bf16[1,32], index: 9, kind: input, shape index: {}]   ;;  %s2727_s10 = inlined_call_operand.<no memory space> [shape: f32[1], index: 10, kind: input, shape index: {}]   ;;  %s2728_s11 = inlined_call_operand.vmem [shape: f32[1,512], index: 11, kind: output, shape index: {}]  }
   0x1   :  { %18 = vsyncpa [#allocation6], 0  ;;  %s2120_s17 = smov [#allocation5]  }
   0x2   :  { %s46_s18 = sshll.u32 %s2120_s17, 4  ;;  %s47_s18 = int_to_ptr.vmem [resolvable:$true] %s46_s18 }
   0x3   :  { %s2064_s19 = scalar_lea.vmem %s47_s18, 512  ;;  %p2069_p1 = scmp.lt.s32.totalorder %s47_s18, %s47_s18 }
   0x4   :  { %p2065_p0 = scmp.ne.s32.totalorder %s47_s18, %s2064_s19  ;;  %p2070_p2 = scmp.lt.s32.totalorder %s2064_s19, %s2064_s19 }
   0x6   :  { %p2071_p3 = por %p2070_p2, %p2069_p1 }
   0x8   :  { %p2072_p4 = pnand %p2071_p3, %p2065_p0 }
   0xa   :  { %2075 = shalt.err (!%p2072_p4)
}
   0xb   :  { %s2121_s20 = smov 128   ;;  %s2122_s21 = smov 8  }
   0xc   :  { %52 = dma.hbm_to_vmem [thread:$0]  %s2723_s6, 512, %s47_s18, [#allocation6], %s2121_s20, %s2121_s20, %s2122_s21  }
   0xd   :  { %s2123_s24 = smov [#allocation3]  }
   0xe   :  { %s26_s25 = sshll.u32 %s2123_s24, 4  ;;  %s27_s25 = int_to_ptr.vmem [resolvable:$true] %s26_s25 }
   0xf   :  { %s2084_s26 = scalar_lea.vmem %s27_s25, 576  ;;  %p2089_p6 = scmp.lt.s32.totalorder %s27_s25, %s27_s25 }
  0x10   :  { %p2085_p5 = scmp.ne.s32.totalorder %s27_s25, %s2084_s26  ;;  %p2090_p7 = scmp.lt.s32.totalorder %s2084_s26, %s2084_s26 }
  0x12   :  { %p2091_p8 = por %p2090_p7, %p2089_p6 }
  0x14   :  { %p2092_p9 = pnand %p2091_p8, %p2085_p5 }
  0x16   :  { %2095 = shalt.err (!%p2092_p9)
}
  0x17   :  { %s2124_s27 = smov 64   ;;  %s2125_s28 = smov 4  }
  0x18   :  { %32 = dma.hbm_to_vmem [thread:$0]  %s2718_s1, 576, %s27_s25, [#allocation4], %s2124_s27, %s2124_s27, %s2125_s28  }
  0x19   :  { %s2126_s12 = smov [#allocation7]  }
  0x1a   :  { %s60_s13 = sshll.u32 %s2126_s12, 4  ;;  %s61_s13 = int_to_ptr.vmem [resolvable:$true] %s60_s13 }
  0x1b   :  { %s2104_s6 = scalar_lea.vmem %s61_s13, 4096  ;;  %p2109_p11 = scmp.lt.s32.totalorder %s61_s13, %s61_s13 }
  0x1c   :  { %p2105_p10 = scmp.ne.s32.totalorder %s61_s13, %s2104_s6  ;;  %p2110_p12 = scmp.lt.s32.totalorder %s2104_s6, %s2104_s6 }
  0x1e   :  { %p2111_p13 = por %p2110_p12, %p2109_p11 }
  0x20   :  { %p2112_p0 = pnand %p2111_p13, %p2105_p10 }
  0x22   :  { %2115 = shalt.err (!%p2112_p0)
}
  0x23   :  { %s2127_s14 = smov 256   ;;  %s2128_s15 = smov 16  }
  0x24   :  { %66 = dma.hbm_to_vmem [thread:$0]  %s2725_s8, 4096, %s61_s13, [#allocation6], %s2127_s14, %s2127_s14, %s2128_s15  }
  0x25   :  { %2116 = dma.done.wait [#allocation4], 576  }
  0x26   :  { %2117 = vsyncadd [#allocation4], 4294966720 }
  0x27   :  { %2118 = dma.done.wait [#allocation6], 4608  }
  0x28   :  { %2119 = vsyncadd [#allocation6], 4294962688  ;;  %v2217_v0 = vld [vmem:[%s2717_s0 + $0x10] sm:$0xff]  ;;  %v2222_v1 = vld [vmem:[%s2717_s0] sm:$0xff]  ;;  %s2129_s22 = smov 111   ;;  %s2130_s26 = smov 113   ;;  %v93_v7 = vlaneseq }
  0x29   :  { %397 = vrot.lane.b32.xlu1 %v2217_v0, %s2129_s22  ;;  %393 = vrot.lane.b32.xlu0 %v2222_v1, %s2129_s22  ;;  %v2231_v2 = vld [vmem:[%s2717_s0 + $0x18] sm:$0xff]  ;;  %v2236_v3 = vld [vmem:[%s2717_s0 + $0x8] sm:$0xff]  ;;  %s2131_s27 = smov 112   ;;  %s2132_s0 = smov 127   ;;  %v2136_v4 = vmov 0   ;;  %vm476_vm1 = vcmask 1043456  }
  0x2a   :  { %s2133_s28 = smov 15   ;;  %s2134_s29 = smov 1   ;;  %521 = vmatprep.mubr.bf16.mxu0 %v2136_v4  ;;  %564 = vmatprep.mubr.bf16.mxu1 %v2136_v4  ;;  %v455_v5 = vld [vmem:[%s2720_s3] sm:$0xff]  ;;  %v456_v6 = vld [vmem:[%s2720_s3 + $0x8] sm:$0xff]  ;;  %v2297_v8 = vshrl.u32 %v93_v7, 7  ;;  %v2300_v9 = vand.u32 127, %v93_v7 }
  0x2b   :  { %s2135_s30 = smov 17   ;;  %1891 = vset.pattern.permute.xlu0 %v2136_v4  ;;  %1892 = vset.pattern.permute.xlu1 %v2136_v4  ;;  %v407_v14 = vld [vmem:[#allocation3 + $0x20] sm:$0xf]  ;;  %v367_v41 = vld [vmem:[#allocation3 + $0x1c] sm:$0xf]  ;;  %vm472_vm9 = vcmask 588800  }
  0x2c   :  { %v2303_v10 = vsub.s32 2, %v2297_v8  ;;  %v2306_v11 = vsub.s32 0, %v2297_v8  ;;  %v2309_v12 = vsub.s32 1, %v2297_v8  ;;  %v2312_v13 = vsub.s32 3, %v2297_v8  ;;  %v327_v42 = vld [vmem:[#allocation3 + $0x18] sm:$0xf] }
  0x2d   :  { %399 = vrot.lane.b32.xlu1 %v2231_v2, %s2129_s22  ;;  %395 = vrot.lane.b32.xlu0 %v2236_v3, %s2129_s22  ;;  %vm401_vm0 = vcmp.lt.s32.totalorder %v2300_v9, 111  ;;  %vm361_vm2 = vcmp.lt.s32.totalorder %v2300_v9, 112  ;;  %vm321_vm3 = vcmp.lt.s32.totalorder %v2300_v9, 113  ;;  %vm281_vm4 = vcmp.lt.s32.totalorder %v2300_v9, 127  ;;  %v247_v62 = vld [vmem:[#allocation3 + $0x10] sm:$0xf] }
  0x2e   :  { %v420_v17 = vrot.slane %v407_v14, %v2303_v10  ;;  %v412_v18 = vrot.slane %v407_v14, %v2306_v11  ;;  %v416_v19 = vrot.slane %v407_v14, %v2309_v12  ;;  %v424_v20 = vrot.slane %v407_v14, %v2312_v13  ;;  %s2138_s19 = smov 121   ;;  %s2139_s20 = smov 7  }
  0x2f   :  { %v344_v43 = vrot.slane %v327_v42, %v2312_v13  ;;  %v336_v44 = vrot.slane %v327_v42, %v2309_v12  ;;  %v340_v48 = vrot.slane %v327_v42, %v2303_v10  ;;  %v372_v50 = vrot.slane %v367_v41, %v2306_v11  ;;  %s2141_s8 = smov 119  }
  0x30   :  { %v384_v52 = vrot.slane %v367_v41, %v2312_v13  ;;  %v376_v53 = vrot.slane %v367_v41, %v2309_v12  ;;  %v380_v54 = vrot.slane %v367_v41, %v2303_v10  ;;  %v332_v55 = vrot.slane %v327_v42, %v2306_v11 }
  0x31   :  { %315 = vrot.lane.b32.xlu1 %v2236_v3, %s2130_s26  ;;  %313 = vrot.lane.b32.xlu0 %v2222_v1, %s2130_s26  ;;  %vm174_vm5 = vcmp.lt.s32.totalorder %v2300_v9, 15  ;;  %vm214_vm6 = vcmp.lt.s32.totalorder %v2300_v9, 1  ;;  %vm95_vm7 = vcmp.lt.s32.totalorder %v2300_v9, 17  ;;  %vm134_vm8 = vcmp.lt.s32.totalorder %v2300_v9, 16 }
  0x32   :  { %vm1197_vm10 = vcmask 130048   ;;  %vm1568_vm11 = vcmask 261120  }
  0x35   :  { %319 = vrot.lane.b32.xlu1 %v2231_v2, %s2130_s26  ;;  %317 = vrot.lane.b32.xlu0 %v2217_v0, %s2130_s26 }
  0x39   :  { %355 = vrot.lane.b32.xlu1 %v2236_v3, %s2131_s27  ;;  %353 = vrot.lane.b32.xlu0 %v2222_v1, %s2131_s27 }
  0x3d   :  { %359 = vrot.lane.b32.xlu1 %v2231_v2, %s2131_s27  ;;  %357 = vrot.lane.b32.xlu0 %v2217_v0, %s2131_s27 }
  0x41   :  { %275 = vrot.lane.b32.xlu1 %v2236_v3, %s2132_s0  ;;  %273 = vrot.lane.b32.xlu0 %v2222_v1, %s2132_s0 }
  0x45   :  { %279 = vrot.lane.b32.xlu1 %v2231_v2, %s2132_s0  ;;  %277 = vrot.lane.b32.xlu0 %v2217_v0, %s2132_s0 }
  0x49   :  { %168 = vrot.lane.b32.xlu1 %v2236_v3, %s2133_s28  ;;  %166 = vrot.lane.b32.xlu0 %v2222_v1, %s2133_s28 }
  0x4d   :  { %172 = vrot.lane.b32.xlu1 %v2231_v2, %s2133_s28  ;;  %170 = vrot.lane.b32.xlu0 %v2217_v0, %s2133_s28 }
  0x51   :  { %208 = vrot.lane.b32.xlu1 %v2236_v3, %s2134_s29  ;;  %206 = vrot.lane.b32.xlu0 %v2222_v1, %s2134_s29 }
  0x55   :  { %212 = vrot.lane.b32.xlu1 %v2231_v2, %s2134_s29  ;;  %210 = vrot.lane.b32.xlu0 %v2217_v0, %s2134_s29 }
  0x59   :  { %87 = vrot.lane.b32.xlu1 %v2236_v3, %s2135_s30  ;;  %85 = vrot.lane.b32.xlu0 %v2222_v1, %s2135_s30 }
  0x5d   :  { %91 = vrot.lane.b32.xlu1 %v2231_v2, %s2135_s30  ;;  %89 = vrot.lane.b32.xlu0 %v2217_v0, %s2135_s30 }
  0x61   :  { %128 = vrot.lane.b32.xlu1 %v2236_v3, %s2128_s15  ;;  %126 = vrot.lane.b32.xlu0 %v2222_v1, %s2128_s15 }
  0x65   :  { %132 = vrot.lane.b32.xlu1 %v2231_v2, %s2128_s15  ;;  %130 = vrot.lane.b32.xlu0 %v2217_v0, %s2128_s15 }
  0x69   :  { %459 = vperm.xlu0 %1891, %v455_v5   ;;  %464 = vperm.xlu1 %1892, %v456_v6  }
  0x9b   :  { %v398_v15 = vpop.permute.xlu1 %397  ;;  %v394_v16 = vpop.permute.xlu0 %393 }
  0x9f   :  { %v400_v21 = vpop.permute.xlu1 %399  ;;  %v396_v22 = vpop.permute.xlu0 %395 }
  0xa0   :  { %v402_v23 = vsel %vm401_vm0, %v398_v15, %v400_v21  ;;  %v405_v24 = vsel %vm401_vm0, %v400_v21, %v394_v16  ;;  %v403_v25 = vsel %vm401_vm0, %v396_v22, %v398_v15  ;;  %v404_v26 = vsel %vm401_vm0, %v394_v16, %v396_v22 }
  0xa1   :  { %v431_v27 = vmul.f32 %v420_v17, %v402_v23  ;;  %v429_v28 = vmul.f32 %v412_v18, %v404_v26  ;;  %v430_v29 = vmul.f32 %v416_v19, %v403_v25  ;;  %v432_v30 = vmul.f32 %v424_v20, %v405_v24  ;;  %v287_v19 = vld [vmem:[#allocation3 + $0x14] sm:$0xf] }
  0xa2   :  { %v256_v21 = vrot.slane %v247_v62, %v2309_v12  ;;  %v264_v22 = vrot.slane %v247_v62, %v2312_v13  ;;  %v252_v23 = vrot.slane %v247_v62, %v2306_v11 }
  0xa3   :  { %v316_v31 = vpop.permute.xlu1 %315  ;;  %v314_v32 = vpop.permute.xlu0 %313  ;;  %v450_v33 = vpack.c.bf16 %v430_v29, %v430_v29  ;;  %v452_v34 = vpack.c.bf16 %v432_v30, %v432_v30  ;;  %v449_v35 = vpack.c.bf16 %v429_v28, %v429_v28  ;;  %v451_v36 = vpack.c.bf16 %v431_v27, %v431_v27 }
  0xa4   :  { %v324_v57 = vsel %vm321_vm3, %v314_v32, %v316_v31  ;;  %v260_v29 = vrot.slane %v247_v62, %v2303_v10  ;;  %v292_v30 = vrot.slane %v287_v19, %v2306_v11 }
  0xa5   :  { %1731 = vmatprep.subr.msk.bf16.mxu0 %vm476_vm1, %v450_v33  ;;  %1733 = vmatprep.subr.msk.bf16.mxu1 %vm476_vm1, %v452_v34  ;;  %v478_v37 = vsel %vm476_vm1, %v449_v35, 0  ;;  %v484_v38 = vsel %vm476_vm1, %v451_v36, 0  ;;  %v349_v20 = vmul.f32 %v332_v55, %v324_v57  ;;  %v296_v34 = vrot.slane %v287_v19, %v2309_v12 }
  0xa6   :  { %496 = vmatpush1.bf16.msra.mxu0 %v478_v37  ;;  %539 = vmatpush1.bf16.msra.mxu1 %v484_v38  ;;  %v300_v35 = vrot.slane %v287_v19, %v2303_v10  ;;  %v270_v38 = vmul.f32 %v256_v21, %v2236_v3  ;;  %v271_v41 = vmul.f32 %v260_v29, %v2217_v0  ;;  %v180_v0 = vld [vmem:[#allocation3 + $0x8] sm:$0xf] }
  0xa7   :  { %v320_v39 = vpop.permute.xlu1 %319  ;;  %v318_v40 = vpop.permute.xlu0 %317  ;;  %v189_v55 = vrot.slane %v180_v0, %v2309_v12 }
  0xa8   :  { %v325_v47 = vsel %vm321_vm3, %v320_v39, %v314_v32  ;;  %v323_v49 = vsel %vm321_vm3, %v316_v31, %v318_v40  ;;  %v322_v56 = vsel %vm321_vm3, %v318_v40, %v320_v39  ;;  %v304_v32 = vrot.slane %v287_v19, %v2312_v13 }
  0xa9   :  { %v352_v58 = vmul.f32 %v344_v43, %v325_v47  ;;  %v350_v59 = vmul.f32 %v336_v44, %v323_v49  ;;  %v351_v15 = vmul.f32 %v340_v48, %v322_v56  ;;  %v272_v39 = vmul.f32 %v264_v22, %v2231_v2 }
  0xaa   :  { %v269_v40 = vmul.f32 %v252_v23, %v2222_v1 }
  0xab   :  { %v356_v45 = vpop.permute.xlu1 %355  ;;  %v354_v46 = vpop.permute.xlu0 %353 }
  0xac   :  { %v364_v51 = vsel %vm361_vm2, %v354_v46, %v356_v45 }
  0xad   :  { %v389_v63 = vmul.f32 %v372_v50, %v364_v51 }
  0xaf   :  { %v360_v60 = vpop.permute.xlu1 %359  ;;  %v358_v61 = vpop.permute.xlu0 %357  ;;  %v445_v31 = vpack.c.bf16 %v389_v63, %v349_v20 }
  0xb0   :  { %v365_v5 = vsel %vm361_vm2, %v360_v60, %v354_v46  ;;  %v362_v6 = vsel %vm361_vm2, %v358_v61, %v360_v60  ;;  %v363_v14 = vsel %vm361_vm2, %v356_v45, %v358_v61  ;;  %v197_v60 = vrot.slane %v180_v0, %v2312_v13 }
  0xb1   :  { %v392_v16 = vmul.f32 %v384_v52, %v365_v5  ;;  %v390_v17 = vmul.f32 %v376_v53, %v363_v14  ;;  %v391_v18 = vmul.f32 %v380_v54, %v362_v6  ;;  %v220_v52 = vld [vmem:[#allocation3 + $0xc] sm:$0xf] }
  0xb2   :  { %v229_v56 = vrot.slane %v220_v52, %v2309_v12  ;;  %v225_v6 = vrot.slane %v220_v52, %v2306_v11  ;;  %v233_v14 = vrot.slane %v220_v52, %v2303_v10 }
  0xb3   :  { %v276_v24 = vpop.permute.xlu1 %275  ;;  %v274_v25 = vpop.permute.xlu0 %273  ;;  %v446_v26 = vpack.c.bf16 %v390_v17, %v350_v59  ;;  %v448_v27 = vpack.c.bf16 %v392_v16, %v352_v58  ;;  %v447_v28 = vpack.c.bf16 %v391_v18, %v351_v15  ;;  %v185_v58 = vrot.slane %v180_v0, %v2306_v11 }
  0xb4   :  { %v284_v33 = vsel %vm281_vm4, %v274_v25, %v276_v24  ;;  %v193_v59 = vrot.slane %v180_v0, %v2303_v10  ;;  %v237_v18 = vrot.slane %v220_v52, %v2312_v13 }
  0xb5   :  { %497 = vmatprep.subr.bf16.mxu0 %v446_v26  ;;  %540 = vmatprep.subr.bf16.mxu1 %v448_v27  ;;  %v309_v42 = vmul.f32 %v292_v30, %v284_v33 }
  0xb6   :  { %498 = vmatpush1.bf16.msra.mxu0 %v445_v31  ;;  %541 = vmatpush1.bf16.msra.mxu1 %v447_v28 }
  0xb7   :  { %v280_v36 = vpop.permute.xlu1 %279  ;;  %v278_v37 = vpop.permute.xlu0 %277  ;;  %v441_v51 = vpack.c.bf16 %v309_v42, %v269_v40 }
  0xb8   :  { %v285_v43 = vsel %vm281_vm4, %v280_v36, %v274_v25  ;;  %v282_v44 = vsel %vm281_vm4, %v278_v37, %v280_v36  ;;  %v283_v45 = vsel %vm281_vm4, %v276_v24, %v278_v37  ;;  %v100_v37 = vld [vmem:[#allocation3] sm:$0xf] }
  0xb9   :  { %v312_v46 = vmul.f32 %v304_v32, %v285_v43  ;;  %v310_v47 = vmul.f32 %v296_v34, %v283_v45  ;;  %v311_v48 = vmul.f32 %v300_v35, %v282_v44  ;;  %v105_v44 = vrot.slane %v100_v37, %v2306_v11 }
  0xba   :  { %v113_v45 = vrot.slane %v100_v37, %v2303_v10 }
  0xbb   :  { %v169_v3 = vpop.permute.xlu1 %168  ;;  %v167_v49 = vpop.permute.xlu0 %166  ;;  %v442_v2 = vpack.c.bf16 %v310_v47, %v270_v38  ;;  %v444_v50 = vpack.c.bf16 %v312_v46, %v272_v39  ;;  %v443_v1 = vpack.c.bf16 %v311_v48, %v271_v41  ;;  %v140_v38 = vld [vmem:[#allocation3 + $0x4] sm:$0xf]  ;;  %v109_v41 = vrot.slane %v100_v37, %v2309_v12 }
  0xbc   :  { %v177_v57 = vsel %vm174_vm5, %v167_v49, %v169_v3  ;;  %v149_v42 = vrot.slane %v140_v38, %v2309_v12  ;;  %v117_v46 = vrot.slane %v100_v37, %v2312_v13  ;;  %v153_v12 = vrot.slane %v140_v38, %v2303_v10 }
  0xbd   :  { %499 = vmatprep.subr.bf16.mxu0 %v442_v2  ;;  %542 = vmatprep.subr.bf16.mxu1 %v444_v50  ;;  %v203_v15 = vmul.f32 %v189_v55, %v177_v57  ;;  %v145_v2 = vrot.slane %v140_v38, %v2306_v11  ;;  %v157_v0 = vrot.slane %v140_v38, %v2312_v13  ;;  %v1964_v38 = vld [vmem:[%s2721_s4 + $0xe8] sm:$0xff]  }
  0xbe   :  { %500 = vmatpush1.bf16.msra.mxu0 %v441_v51  ;;  %543 = vmatpush1.bf16.msra.mxu1 %v443_v1 }
  0xbf   :  { %v173_v53 = vpop.permute.xlu1 %172  ;;  %v171_v54 = vpop.permute.xlu0 %170 }
  0xc0   :  { %v178_v63 = vsel %vm174_vm5, %v173_v53, %v167_v49  ;;  %v176_v16 = vsel %vm174_vm5, %v169_v3, %v171_v54  ;;  %v175_v19 = vsel %vm174_vm5, %v171_v54, %v173_v53 }
  0xc1   :  { %v202_v20 = vmul.f32 %v185_v58, %v178_v63  ;;  %v204_v24 = vmul.f32 %v193_v59, %v176_v16  ;;  %v205_v28 = vmul.f32 %v197_v60, %v175_v19  ;;  %v1956_v16 = vld [vmem:[%s2721_s4 + $0xf8] sm:$0xff]   ;;  %v1959_v19 = vld [vmem:[%s2721_s4 + $0x30] sm:$0xff]  }
  0xc3   :  { %v209_v61 = vpop.permute.xlu1 %208  ;;  %v207_v62 = vpop.permute.xlu0 %206 }
  0xc4   :  { %v217_v5 = vsel %vm214_vm6, %v207_v62, %v209_v61 }
  0xc5   :  { %v243_v17 = vmul.f32 %v229_v56, %v217_v5 }
  0xc7   :  { %v213_v21 = vpop.permute.xlu1 %212  ;;  %v211_v22 = vpop.permute.xlu0 %210  ;;  %v438_v23 = vpack.c.bf16 %v243_v17, %v203_v15  ;;  %v1955_v15 = vld [vmem:[%s2721_s4 + $0x38] sm:$0xff]  }
  0xc8   :  { %v218_v25 = vsel %vm214_vm6, %v213_v21, %v207_v62  ;;  %v215_v26 = vsel %vm214_vm6, %v211_v22, %v213_v21  ;;  %v216_v27 = vsel %vm214_vm6, %v209_v61, %v211_v22  ;;  %v1957_v17 = vld [vmem:[%s2721_s4 + $0xb8] sm:$0xff]   ;;  %v1960_v22 = vld [vmem:[%s2721_s4 + $0xf0] sm:$0xff]  }
  0xc9   :  { %v242_v29 = vmul.f32 %v225_v6, %v218_v25  ;;  %v244_v30 = vmul.f32 %v233_v14, %v216_v27  ;;  %v245_v31 = vmul.f32 %v237_v18, %v215_v26  ;;  %501 = vmatprep.subr.bf16.mxu0 %v438_v23  ;;  %v1953_v6 = vld [vmem:[%s2719_s2] sm:$0xff]   ;;  %v1954_v14 = vld [vmem:[%s2721_s4 + $0x78] sm:$0xff]   ;;  %v1958_v18 = vld [vmem:[%s2721_s4 + $0x70] sm:$0xff]   ;;  %s2140_s2 = smov 9  }
  0xca   :  { %v1962_v27 = vld [vmem:[%s2721_s4 + $0x68] sm:$0xff]  }
  0xcb   :  { %v88_v32 = vpop.permute.xlu1 %87  ;;  %v86_v33 = vpop.permute.xlu0 %85  ;;  %v437_v34 = vpack.c.bf16 %v242_v29, %v202_v20  ;;  %v440_v35 = vpack.c.bf16 %v245_v31, %v205_v28  ;;  %v439_v36 = vpack.c.bf16 %v244_v30, %v204_v24  ;;  %v1961_v24 = vld [vmem:[%s2721_s4 + $0xb0] sm:$0xff]   ;;  %v1963_v30 = vld [vmem:[%s2721_s4 + $0x28] sm:$0xff]  }
  0xcc   :  { %v98_v43 = vsel %vm95_vm7, %v86_v33, %v88_v32 }
  0xcd   :  { %502 = vmatpush1.bf16.msra.mxu0 %v437_v34  ;;  %544 = vmatprep.subr.bf16.mxu1 %v440_v35  ;;  %v123_v50 = vmul.f32 %v109_v41, %v98_v43  ;;  %v1965_v43 = vld [vmem:[%s2721_s4 + $0xa8] sm:$0xff]  }
  0xce   :  { %545 = vmatpush1.bf16.msra.mxu1 %v439_v36 }
  0xcf   :  { %v92_v39 = vpop.permute.xlu1 %91  ;;  %v90_v40 = vpop.permute.xlu0 %89 }
  0xd0   :  { %v99_v3 = vsel %vm95_vm7, %v92_v39, %v86_v33  ;;  %v97_v1 = vsel %vm95_vm7, %v88_v32, %v90_v40  ;;  %v96_v52 = vsel %vm95_vm7, %v90_v40, %v92_v39 }
  0xd1   :  { %v122_v53 = vmul.f32 %v105_v44, %v99_v3  ;;  %v124_v57 = vmul.f32 %v113_v45, %v97_v1  ;;  %v125_v59 = vmul.f32 %v117_v46, %v96_v52  ;;  %v1970_v52 = vld [vmem:[%s2721_s4 + $0x58] sm:$0xff]  }
  0xd3   :  { %v129_v47 = vpop.permute.xlu1 %128  ;;  %v127_v48 = vpop.permute.xlu0 %126 }
  0xd4   :  { %v137_v49 = vsel %vm134_vm8, %v127_v48, %v129_v47 }
  0xd5   :  { %v163_v51 = vmul.f32 %v149_v42, %v137_v49 }
  0xd7   :  { %v133_v54 = vpop.permute.xlu1 %132  ;;  %v131_v55 = vpop.permute.xlu0 %130  ;;  %v434_v56 = vpack.c.bf16 %v163_v51, %v123_v50  ;;  %v1968_v50 = vld [vmem:[%s2721_s4 + $0xe0] sm:$0xff]  }
  0xd8   :  { %v138_v11 = vsel %vm134_vm8, %v133_v54, %v127_v48  ;;  %v135_v10 = vsel %vm134_vm8, %v131_v55, %v133_v54  ;;  %v136_v58 = vsel %vm134_vm8, %v129_v47, %v131_v55  ;;  %v1966_v47 = vld [vmem:[%s2721_s4 + $0x60] sm:$0xff]   ;;  %v1971_v55 = vld [vmem:[%s2721_s4 + $0x18] sm:$0xff]  }
  0xd9   :  { %v162_v60 = vmul.f32 %v145_v2, %v138_v11  ;;  %v164_v13 = vmul.f32 %v153_v12, %v136_v58  ;;  %v165_v61 = vmul.f32 %v157_v0, %v135_v10  ;;  %503 = vmatprep.subr.bf16.mxu0 %v434_v56  ;;  %v1967_v12 = vld [vmem:[%s2721_s4 + $0x20] sm:$0xff]   ;;  %v1972_v56 = vld [vmem:[%s2721_s4 + $0xd8] sm:$0xff]   ;;  %v1974_v10 = vld [vmem:[%s2721_s4 + $0x50] sm:$0xff]  }
  0xda   :  { %v1969_v0 = vld [vmem:[%s2721_s4 + $0xa0] sm:$0xff]   ;;  %v1973_v11 = vld [vmem:[%s2721_s4 + $0x98] sm:$0xff]   ;;  %v1975_v58 = vld [vmem:[%s2721_s4 + $0x10] sm:$0xff]  }
  0xdb   :  { %v433_v62 = vpack.c.bf16 %v162_v60, %v122_v53  ;;  %v436_v63 = vpack.c.bf16 %v165_v61, %v125_v59  ;;  %v435_v5 = vpack.c.bf16 %v164_v13, %v124_v57  ;;  %v1976_v59 = vld [vmem:[%s2721_s4 + $0xd0] sm:$0xff]   ;;  %v1978_v13 = vld [vmem:[%s2721_s4 + $0x48] sm:$0xff]  }
  0xdc   :  { %v1977_v60 = vld [vmem:[%s2721_s4 + $0x90] sm:$0xff]   ;;  %v1979_v61 = vld [vmem:[%s2721_s4 + $0x8] sm:$0xff]  }
  0xdd   :  { %504 = vmatpush1.bf16.msra.mxu0 %v433_v62  ;;  %546 = vmatprep.subr.bf16.mxu1 %v436_v63  ;;  %v1980_v62 = vld [vmem:[%s2721_s4 + $0xc8] sm:$0xff]  }
  0xde   :  { %547 = vmatpush1.bf16.msra.mxu1 %v435_v5  ;;  %1824 = vmatprep.subr.bf16.mxu0 %v1954_v14  ;;  %v1981_v63 = vld [vmem:[%s2721_s4 + $0x88] sm:$0xff]   ;;  %v1982_v5 = vld [vmem:[%s2721_s4 + $0x40] sm:$0xff]  }
  0xdf   :  { %1846 = vmatprep.subr.bf16.mxu1 %v1956_v16  ;;  %v1984_v14 = vld [vmem:[%s2721_s4 + $0xc0] sm:$0xff]  }
  0xe0   :  { %1732 = vmatmul.mubr.msk.bf16.vlgmr.msra.gmra.mxu0 %vm472_vm9, %v1953_v6 }
  0xe1   :  { %1734 = vmatmul.mubr.msk.bf16.vlgmr.msra.gmra.mxu1 %vm472_vm9, %v1953_v6  ;;  %1825 = vmatpush3.bf16.msra.mxu0 %v1955_v15  ;;  %v1983_v6 = vld [vmem:[%s2721_s4] sm:$0xff]  }
  0xe2   :  { %1847 = vmatpush3.bf16.msra.mxu1 %v1957_v17  ;;  %1826 = vmatprep.subr.bf16.mxu0 %v1958_v18  ;;  %v1985_v15 = vld [vmem:[%s2721_s4 + $0x80] sm:$0xff]   ;;  %s2137_s4 = smov 120  }
  0xe3   :  { %1848 = vmatprep.subr.bf16.mxu1 %v1960_v22 }
  0xe4   :  { %v460_v20 = vpop.permute.xlu0 %459  ;;  %v465_v26 = vpop.permute.xlu1 %464 }
  0xe5   :  { %1827 = vmatpush3.bf16.msra.mxu0 %v1959_v19 }
  0xe6   :  { %1849 = vmatpush3.bf16.msra.mxu1 %v1961_v24  ;;  %1828 = vmatprep.subr.bf16.mxu0 %v1962_v27 }
  0xe7   :  { %1850 = vmatprep.subr.bf16.mxu1 %v1964_v38 }
  0xe9   :  { %1829 = vmatpush3.bf16.msra.mxu0 %v1963_v30 }
  0xea   :  { %1851 = vmatpush3.bf16.msra.mxu1 %v1965_v43  ;;  %1830 = vmatprep.subr.bf16.mxu0 %v1966_v47 }
  0xeb   :  { %1852 = vmatprep.subr.bf16.mxu1 %v1968_v50 }
  0xed   :  { %1831 = vmatpush3.bf16.msra.mxu0 %v1967_v12 }
  0xee   :  { %1853 = vmatpush3.bf16.msra.mxu1 %v1969_v0  ;;  %1832 = vmatprep.subr.bf16.mxu0 %v1970_v52 }
  0xef   :  { %1854 = vmatprep.subr.bf16.mxu1 %v1972_v56 }
  0xf1   :  { %1833 = vmatpush3.bf16.msra.mxu0 %v1971_v55 }
  0xf2   :  { %1855 = vmatpush3.bf16.msra.mxu1 %v1973_v11  ;;  %1834 = vmatprep.subr.bf16.mxu0 %v1974_v10 }
  0xf3   :  { %1856 = vmatprep.subr.bf16.mxu1 %v1976_v59 }
  0xf5   :  { %1835 = vmatpush3.bf16.msra.mxu0 %v1975_v58 }
  0xf6   :  { %1857 = vmatpush3.bf16.msra.mxu1 %v1977_v60  ;;  %1836 = vmatprep.subr.bf16.mxu0 %v1978_v13 }
  0xf7   :  { %1858 = vmatprep.subr.bf16.mxu1 %v1980_v62 }
  0xf9   :  { %1837 = vmatpush3.bf16.msra.mxu0 %v1979_v61 }
  0xfa   :  { %1859 = vmatpush3.bf16.msra.mxu1 %v1981_v63  ;;  %1838 = vmatprep.subr.bf16.mxu0 %v1982_v5 }
  0xfb   :  { %1860 = vmatprep.subr.bf16.mxu1 %v1984_v14 }
  0xfd   :  { %1839 = vmatpush3.bf16.msra.mxu0 %v1983_v6 }
  0xfe   :  { %1204 = vmatprep.subr.bf16.mxu0 %v2136_v4  ;;  %1861 = vmatpush3.bf16.msra.mxu1 %v1985_v15 }
 0x1a0   :  { %v523_v21 = vpop.f32.mrf.mxu0 }
 0x1a1   :  { %v566_v23 = vpop.f32.mrf.mxu1  ;;  %v2448_v28 = vadd.f32 %v523_v21, %v460_v20 }
 0x1a2   :  { %v525_v25 = vpop.f32.mrf.mxu0  ;;  %v2453_v31 = vadd.f32 %v566_v23, %v460_v20 }
 0x1a3   :  { %v568_v29 = vpop.f32.mrf.mxu1  ;;  %v2455_v33 = vadd.f32 %v525_v25, %v460_v20  ;;  %v575_v39 = vmax.f32 %v2448_v28, 0.0 }
 0x1a4   :  { %v527_v32 = vpop.f32.mrf.mxu0  ;;  %v577_v44 = vmax.f32 %v2453_v31, 0.0  ;;  %v2472_v45 = vadd.f32 %v568_v29, %v460_v20 }
 0x1a5   :  { %v2457_v34 = vadd.f32 %v527_v32, %v465_v26  ;;  %v570_v35 = vpop.f32.mrf.mxu1  ;;  %v576_v48 = vmax.f32 %v2455_v33, 0.0 }
 0x1a6   :  { %v2459_v36 = vadd.f32 %v570_v35, %v465_v26  ;;  %v529_v37 = vpop.f32.mrf.mxu0  ;;  %v578_v53 = vmax.f32 %v2472_v45, 0.0 }
 0x1a7   :  { %v579_v40 = vmax.f32 %v2457_v34, 0.0  ;;  %v2466_v41 = vadd.f32 %v529_v37, %v465_v26  ;;  %v572_v42 = vpop.f32.mrf.mxu1 }
 0x1a8   :  { %v2474_v46 = vadd.f32 %v572_v42, %v465_v26  ;;  %v581_v3 = vmax.f32 %v2459_v36, 0.0 }
 0x1a9   :  { %v580_v49 = vmax.f32 %v2466_v41, 0.0  ;;  %v1893_v2 = vpack.i.bf16 %v579_v40, %v575_v39 }
 0x1aa   :  { %v582_v1 = vmax.f32 %v2474_v46, 0.0  ;;  %v1898_v54 = vpack.i.bf16 %v581_v3, %v577_v44 }
 0x1ab   :  { %1894 = vrot.lane.b32.xlu1 %v1893_v2, %s2132_s0  ;;  %v1923_v51 = vpack.i.bf16 %v580_v49, %v576_v48 }
 0x1ac   :  { %v1928_v57 = vpack.i.bf16 %v582_v1, %v578_v53 }
 0x1ad   :  { %1924 = vrot.lane.b32.xlu0 %v1923_v51, %s2132_s0 }
 0x1af   :  { %1899 = vrot.lane.b32.xlu1 %v1898_v54, %s2132_s0 }
 0x1b1   :  { %1929 = vrot.lane.b32.xlu0 %v1928_v57, %s2132_s0 }
 0x1b3   :  { %1904 = vrot.lane.b32.xlu1 %v1893_v2, %s2131_s27 }
 0x1b5   :  { %1934 = vrot.lane.b32.xlu0 %v1923_v51, %s2131_s27 }
 0x1b7   :  { %1909 = vrot.lane.b32.xlu1 %v1898_v54, %s2131_s27 }
 0x1b9   :  { %1939 = vrot.lane.b32.xlu0 %v1928_v57, %s2131_s27 }
 0x1bb   :  { %1914 = vrot.lane.b32.xlu1 %v1893_v2, %s2129_s22 }
 0x1bd   :  { %1944 = vrot.lane.b32.xlu0 %v1923_v51, %s2129_s22 }
 0x1bf   :  { %1919 = vrot.lane.b32.xlu1 %v1898_v54, %s2129_s22 }
 0x1c1   :  { %1949 = vrot.lane.b32.xlu0 %v1928_v57, %s2129_s22 }
 0x21d   :  { %v1895_v16 = vpop.permute.xlu1 %1894 }
 0x21e   :  { %v1897_v22 = vunpack.i.h.bf16 %v1895_v16  ;;  %v1896_v23 = vunpack.i.l.bf16 %v1895_v16 }
 0x21f   :  { %v1925_v17 = vpop.permute.xlu0 %1924 }
 0x220   :  { %v1927_v19 = vunpack.i.h.bf16 %v1925_v17  ;;  %v1926_v20 = vunpack.i.l.bf16 %v1925_v17 }
 0x221   :  { %v1900_v18 = vpop.permute.xlu1 %1899 }
 0x222   :  { %v1902_v25 = vunpack.i.h.bf16 %v1900_v18  ;;  %v1901_v26 = vunpack.i.l.bf16 %v1900_v18  ;;  %v603_v27 = vsel %vm281_vm4, %v1896_v23, %v1926_v20  ;;  %v604_v29 = vsel %vm281_vm4, %v1897_v22, %v1927_v19 }
 0x223   :  { %v1930_v21 = vpop.permute.xlu0 %1929  ;;  %v655_v38 = vmax.f32 %v575_v39, %v603_v27  ;;  %v659_v42 = vmax.f32 %v579_v40, %v604_v29 }
 0x224   :  { %v1931_v30 = vunpack.i.l.bf16 %v1930_v21  ;;  %v1932_v35 = vunpack.i.h.bf16 %v1930_v21  ;;  %v602_v43 = vsel %vm281_vm4, %v1927_v19, %v1902_v25  ;;  %v601_v47 = vsel %vm281_vm4, %v1926_v20, %v1901_v26 }
 0x225   :  { %v1905_v24 = vpop.permute.xlu1 %1904  ;;  %v660_v11 = vmax.f32 %v580_v49, %v602_v43  ;;  %v656_v10 = vmax.f32 %v576_v48, %v601_v47 }
 0x226   :  { %v599_v2 = vsel %vm281_vm4, %v1901_v26, %v1931_v30  ;;  %v605_v12 = vsel %vm281_vm4, %v1931_v30, %v1896_v23  ;;  %v600_v28 = vsel %vm281_vm4, %v1902_v25, %v1932_v35  ;;  %v606_v34 = vsel %vm281_vm4, %v1932_v35, %v1897_v22 }
 0x227   :  { %v1935_v32 = vpop.permute.xlu0 %1934  ;;  %v1907_v39 = vunpack.i.h.bf16 %v1905_v24  ;;  %v1906_v40 = vunpack.i.l.bf16 %v1905_v24  ;;  %v657_v58 = vmax.f32 %v577_v44, %v599_v2  ;;  %v658_v59 = vmax.f32 %v578_v53, %v605_v12 }
 0x228   :  { %v1937_v50 = vunpack.i.h.bf16 %v1935_v32  ;;  %v1936_v51 = vunpack.i.l.bf16 %v1935_v32  ;;  %v661_v60 = vmax.f32 %v581_v3, %v600_v28  ;;  %v662_v13 = vmax.f32 %v582_v1, %v606_v34 }
 0x229   :  { %v1910_v37 = vpop.permute.xlu1 %1909 }
 0x22a   :  { %v1912_v52 = vunpack.i.h.bf16 %v1910_v37  ;;  %v1911_v54 = vunpack.i.l.bf16 %v1910_v37  ;;  %v627_v61 = vsel %vm361_vm2, %v1906_v40, %v1936_v51  ;;  %v628_v41 = vsel %vm361_vm2, %v1907_v39, %v1937_v50 }
 0x22b   :  { %v1940_v0 = vpop.permute.xlu0 %1939 }
 0x22c   :  { %v1942_v55 = vunpack.i.h.bf16 %v1940_v0  ;;  %v1941_v56 = vunpack.i.l.bf16 %v1940_v0  ;;  %v626_v45 = vsel %vm361_vm2, %v1937_v50, %v1912_v52  ;;  %v625_v36 = vsel %vm361_vm2, %v1936_v51, %v1911_v54 }
 0x22d   :  { %v1915_v57 = vpop.permute.xlu1 %1914 }
 0x22e   :  { %v1917_v48 = vunpack.i.h.bf16 %v1915_v57  ;;  %v1916_v49 = vunpack.i.l.bf16 %v1915_v57  ;;  %v623_v46 = vsel %vm361_vm2, %v1911_v54, %v1941_v56  ;;  %v624_v3 = vsel %vm361_vm2, %v1912_v52, %v1942_v55 }
 0x22f   :  { %v1945_v33 = vpop.permute.xlu0 %1944  ;;  %v629_v6 = vsel %vm361_vm2, %v1941_v56, %v1906_v40  ;;  %v630_v14 = vsel %vm361_vm2, %v1942_v55, %v1907_v39 }
 0x230   :  { %v1947_v31 = vunpack.i.h.bf16 %v1945_v33  ;;  %v1946_v44 = vunpack.i.l.bf16 %v1945_v33 }
 0x231   :  { %v1920_v1 = vpop.permute.xlu1 %1919 }
 0x232   :  { %v651_v53 = vsel %vm401_vm0, %v1916_v49, %v1946_v44  ;;  %v652_v62 = vsel %vm401_vm0, %v1917_v48, %v1947_v31  ;;  %v1922_v63 = vunpack.i.h.bf16 %v1920_v1  ;;  %v1921_v5 = vunpack.i.l.bf16 %v1920_v1  ;;  %v1997_v1 = vld [vmem:[#allocation7 + $0xc4] ss:$16 sps:$4 sm:$0xff]  }
 0x233   :  { %v663_v15 = vmax.f32 %v627_v61, %v651_v53  ;;  %v667_v16 = vmax.f32 %v628_v41, %v652_v62  ;;  %v1950_v17 = vpop.permute.xlu0 %1949  ;;  %v1995_v53 = vld [vmem:[#allocation7 + $0xc0] ss:$16 sps:$4 sm:$0xff]   ;;  %v2000_v62 = vld [vmem:[#allocation7 + $0xa4] ss:$16 sps:$4 sm:$0xff]  }
 0x234   :  { %v650_v18 = vsel %vm401_vm0, %v1947_v31, %v1922_v63  ;;  %v649_v19 = vsel %vm401_vm0, %v1946_v44, %v1921_v5  ;;  %v1952_v20 = vunpack.i.h.bf16 %v1950_v17  ;;  %v1951_v21 = vunpack.i.l.bf16 %v1950_v17  ;;  %v1155_v31 = vld [vmem:[%s2724_s7] sm:$0xff]  ;;  %v1156_v44 = vld [vmem:[%s2724_s7 + $0x8] sm:$0xff] }
 0x235   :  { %v671_v22 = vmax.f32 %v655_v38, %v663_v15  ;;  %v675_v23 = vmax.f32 %v659_v42, %v667_v16  ;;  %v664_v24 = vmax.f32 %v625_v36, %v649_v19  ;;  %v668_v25 = vmax.f32 %v626_v45, %v650_v18  ;;  %v1157_v45 = vld [vmem:[%s2724_s7 + $0x10] sm:$0xff]  ;;  %v1158_v36 = vld [vmem:[%s2724_s7 + $0x18] sm:$0xff]  ;;  %v1781_v19 = vld [vmem:[%s2722_s5 + $0x7] ss:$0 sm:$0xff] }
 0x236   :  { %v647_v26 = vsel %vm401_vm0, %v1921_v5, %v1951_v21  ;;  %v648_v27 = vsel %vm401_vm0, %v1922_v63, %v1952_v20  ;;  %v653_v29 = vsel %vm401_vm0, %v1951_v21, %v1916_v49  ;;  %v654_v30 = vsel %vm401_vm0, %v1952_v20, %v1917_v48  ;;  %v1986_v49 = vld [vmem:[#allocation5 + $0x4] ss:$8 sps:$4 sm:$0xff]   ;;  %v1998_v63 = vld [vmem:[#allocation7 + $0xa0] ss:$16 sps:$4 sm:$0xff]  }
 0x237   :  { %v665_v32 = vmax.f32 %v623_v46, %v647_v26  ;;  %v666_v35 = vmax.f32 %v629_v6, %v653_v29  ;;  %v669_v37 = vmax.f32 %v624_v3, %v648_v27  ;;  %v670_v43 = vmax.f32 %v630_v14, %v654_v30  ;;  %v1992_v46 = vld [vmem:[#allocation7 + $0xe0] ss:$16 sps:$4 sm:$0xff]   ;;  %v1994_v3 = vld [vmem:[#allocation7 + $0xe4] ss:$16 sps:$4 sm:$0xff]  }
 0x238   :  { %v672_v38 = vmax.f32 %v656_v10, %v664_v24  ;;  %v676_v42 = vmax.f32 %v660_v11, %v668_v25  ;;  %v679_v0 = vpack.c.bf16 %v675_v23, %v671_v22  ;;  %1451 = vmatprep.subr.bf16.mxu1 %v1994_v3  ;;  %v2003_v5 = vld [vmem:[#allocation7 + $0x84] ss:$16 sps:$4 sm:$0xff]   ;;  %v2001_v6 = vld [vmem:[#allocation7 + $0x80] ss:$16 sps:$4 sm:$0xff]   ;;  %vm1721_vm0 = vcmp.lt.s32.totalorder %v93_v7, 512 }
 0x239   :  { %v673_v47 = vmax.f32 %v657_v58, %v665_v32  ;;  %v677_v2 = vmax.f32 %v661_v60, %v669_v37  ;;  %v674_v12 = vmax.f32 %v658_v59, %v666_v35  ;;  %v678_v50 = vmax.f32 %v662_v13, %v670_v43  ;;  %v1775_v13 = vld [vmem:[%s2722_s5 + $0x4] ss:$0 sm:$0xff]  ;;  %v2006_v14 = vld [vmem:[#allocation7 + $0x64] ss:$16 sps:$4 sm:$0xff]   ;;  %v1779_v24 = vld [vmem:[%s2722_s5 + $0x6] ss:$0 sm:$0xff] }
 0x23a   :  { %v680_v51 = vpack.c.bf16 %v676_v42, %v672_v38  ;;  %v2004_v15 = vld [vmem:[#allocation7 + $0x60] ss:$16 sps:$4 sm:$0xff]   ;;  %v2009_v16 = vld [vmem:[#allocation7 + $0x44] ss:$16 sps:$4 sm:$0xff]  }
 0x23b   :  { %v682_v28 = vpack.c.bf16 %v678_v50, %v674_v12  ;;  %v681_v34 = vpack.c.bf16 %v677_v2, %v673_v47  ;;  %v2007_v17 = vld [vmem:[#allocation7 + $0x40] ss:$16 sps:$4 sm:$0xff]   ;;  %v1773_v50 = vld [vmem:[%s2722_s5 + $0x3] ss:$0 sm:$0xff] }
 0x23c   :  { %971 = vmatprep.mubr.bf16.mxu0 %v680_v51  ;;  %v1777_v32 = vld [vmem:[%s2722_s5 + $0x5] ss:$0 sm:$0xff]  ;;  %v1991_v3 = vld [vmem:[#allocation5 + $0x10] ss:$8 sps:$4 sm:$0xff]  }
 0x23d   :  { %972 = vmatmul.mubr.bf16.vlgmr.msra.gmra.mxu0 %v679_v0  ;;  %1012 = vmatprep.mubr.bf16.mxu1 %v682_v28 }
 0x23e   :  { %1013 = vmatmul.mubr.bf16.vlgmr.msra.gmra.mxu1 %v681_v34  ;;  %1788 = vmatprep.mubr.msk.bf16.mxu0 %vm1197_vm10, %v1986_v49  ;;  %v1771_v34 = vld [vmem:[%s2722_s5 + $0x2] ss:$0 sm:$0xff] }
 0x23f   :  { %1483 = vmatprep.mubr.bf16.mxu1 %v2136_v4  ;;  %1452 = vmatpush1.bf16.msra.mxu1 %v1992_v46  ;;  %v1989_v46 = vld [vmem:[#allocation5 + $0x14] ss:$8 sps:$4 sm:$0xff]  }
 0x240   :  { %1453 = vmatprep.subr.bf16.mxu1 %v1997_v1  ;;  %v2012_v1 = vld [vmem:[#allocation7 + $0x24] ss:$16 sps:$4 sm:$0xff]  }
 0x243   :  { %1454 = vmatpush1.bf16.msra.mxu1 %v1995_v53  ;;  %v2010_v53 = vld [vmem:[#allocation7 + $0x20] ss:$16 sps:$4 sm:$0xff]  }
 0x244   :  { %1455 = vmatprep.subr.bf16.mxu1 %v2000_v62  ;;  %v2015_v62 = vld [vmem:[#allocation7 + $0x4] ss:$16 sps:$4 sm:$0xff]  }
 0x247   :  { %1456 = vmatpush1.bf16.msra.mxu1 %v1998_v63  ;;  %v2013_v63 = vld [vmem:[#allocation7] ss:$16 sps:$4 sm:$0xff]  }
 0x248   :  { %1457 = vmatprep.subr.bf16.mxu1 %v2003_v5  ;;  %v2018_v5 = vld [vmem:[#allocation7 + $0xec] ss:$16 sps:$4 sm:$0xff]  }
 0x24b   :  { %1458 = vmatpush1.bf16.msra.mxu1 %v2001_v6 }
 0x24c   :  { %1459 = vmatprep.subr.bf16.mxu1 %v2006_v14 }
 0x24f   :  { %1460 = vmatpush1.bf16.msra.mxu1 %v2004_v15 }
 0x250   :  { %1461 = vmatprep.subr.bf16.mxu1 %v2009_v16 }
 0x253   :  { %1462 = vmatpush1.bf16.msra.mxu1 %v2007_v17 }
 0x254   :  { %1463 = vmatprep.subr.bf16.mxu1 %v2012_v1 }
 0x257   :  { %1464 = vmatpush1.bf16.msra.mxu1 %v2010_v53 }
 0x258   :  { %1465 = vmatprep.subr.bf16.mxu1 %v2015_v62 }
 0x25b   :  { %1466 = vmatpush1.bf16.msra.mxu1 %v2013_v63 }
 0x25c   :  { %1504 = vmatprep.subr.bf16.mxu1 %v2018_v5 }
 0x2fd   :  { %v1840_v9 = vpop.f32.mrf.mxu0 }
 0x2fe   :  { %v1862_v39 = vpop.f32.mrf.mxu1 }
 0x2ff   :  { %v1841_v40 = vpop.f32.mrf.mxu0 }
 0x300   :  { %v1863_v52 = vpop.f32.mrf.mxu1  ;;  %v1842_v54 = vadd.f32 %v1841_v40, %v1840_v9 }
 0x301   :  { %v1843_v55 = vpop.f32.mrf.mxu0  ;;  %v1864_v56 = vadd.f32 %v1863_v52, %v1862_v39 }
 0x302   :  { %v1865_v57 = vpop.f32.mrf.mxu1 }
 0x303   :  { %v1015_v11 = vadd.f32 %v1864_v56, %v1842_v54  ;;  %v1844_v10 = vpop.f32.mrf.mxu0 }
 0x304   :  { %v1866_v58 = vpop.f32.mrf.mxu1  ;;  %v1845_v59 = vadd.f32 %v1844_v10, %v1843_v55  ;;  %v1769_v55 = vld [vmem:[%s2722_s5 + $0x1] ss:$0 sm:$0xff] }
 0x305   :  { %v1867_v60 = vadd.f32 %v1866_v58, %v1865_v57  ;;  %1114 = vrot.lane.b32.xlu1 %v1015_v11, %s2137_s4  ;;  %v2638_v41 = vmul.f32 %v1775_v13, %v1015_v11 }
 0x307   :  { %v1018_v61 = vadd.f32 %v1867_v60, %v1845_v59  ;;  %v1767_v59 = vld [vmem:[%s2722_s5] ss:$0 sm:$0xff] }
 0x309   :  { %1116 = vrot.lane.b32.xlu0 %v1018_v61, %s2137_s4  ;;  %1100 = vrot.lane.b32.xlu1 %v1015_v11, %s2138_s19  ;;  %v2640_v33 = vmul.f32 %v1775_v13, %v1018_v61 }
 0x30b   :  { %v1146_v48 = vpack.c.bf16 %v2640_v33, %v2638_v41  ;;  %v1783_v33 = vld [vmem:[%s2722_s5 + $0x8] ss:$0 sm:$0xff] }
 0x30d   :  { %1102 = vrot.lane.b32.xlu0 %v1018_v61, %s2138_s19  ;;  %1086 = vrot.lane.b32.xlu1 %v1015_v11, %s2132_s0 }
 0x311   :  { %1088 = vrot.lane.b32.xlu0 %v1018_v61, %s2132_s0  ;;  %1062 = vrot.lane.b32.xlu1 %v1015_v11, %s2134_s29 }
 0x315   :  { %1064 = vrot.lane.b32.xlu0 %v1018_v61, %s2134_s29  ;;  %1048 = vrot.lane.b32.xlu1 %v1015_v11, %s2139_s20 }
 0x319   :  { %1050 = vrot.lane.b32.xlu0 %v1018_v61, %s2139_s20  ;;  %1034 = vrot.lane.b32.xlu1 %v1015_v11, %s2122_s21 }
 0x31d   :  { %1036 = vrot.lane.b32.xlu0 %v1018_v61, %s2122_s21  ;;  %1021 = vrot.lane.b32.xlu1 %v1015_v11, %s2140_s2 }
 0x321   :  { %1023 = vrot.lane.b32.xlu0 %v1018_v61, %s2140_s2  ;;  %1128 = vrot.lane.b32.xlu1 %v1015_v11, %s2141_s8 }
 0x325   :  { %1130 = vrot.lane.b32.xlu0 %v1018_v61, %s2141_s8  ;;  %1161 = vperm.xlu1 %1892, %v1155_v31  }
 0x329   :  { %1166 = vperm.xlu0 %1891, %v1156_v44   ;;  %1171 = vperm.xlu1 %1892, %v1157_v45  }
 0x32d   :  { %1176 = vperm.xlu0 %1891, %v1158_v36   ;;  %v1988_v36 = vld [vmem:[#allocation5] ss:$8 sps:$4 sm:$0xff]  }
 0x377   :  { %v1115_v18 = vpop.permute.xlu1 %1114 }
 0x378   :  { %v1126_v22 = vmul.f32 %v1781_v19, %v1115_v18 }
 0x37b   :  { %v1117_v20 = vpop.permute.xlu0 %1116  ;;  %v1101_v21 = vpop.permute.xlu1 %1100 }
 0x37c   :  { %v1127_v23 = vmul.f32 %v1781_v19, %v1117_v20  ;;  %v1112_v29 = vmul.f32 %v1779_v24, %v1101_v21 }
 0x37e   :  { %v1149_v25 = vpack.c.bf16 %v1127_v23, %v1126_v22 }
 0x37f   :  { %v1103_v26 = vpop.permute.xlu0 %1102  ;;  %v1087_v27 = vpop.permute.xlu1 %1086 }
 0x380   :  { %v1113_v30 = vmul.f32 %v1779_v24, %v1103_v26  ;;  %1205 = vmatpush1.bf16.msra.mxu0 %v1149_v25  ;;  %v1098_v38 = vmul.f32 %v1777_v32, %v1087_v27  ;;  %v2016_v24 = vld [vmem:[#allocation7 + $0xe8] ss:$16 sps:$4 sm:$0xff]   ;;  %v2021_v26 = vld [vmem:[#allocation7 + $0xcc] ss:$16 sps:$4 sm:$0xff]  }
 0x381   :  { %1206 = vmatprep.subr.bf16.mxu0 %v2136_v4 }
 0x382   :  { %v1148_v35 = vpack.c.bf16 %v1113_v30, %v1112_v29 }
 0x383   :  { %v1089_v37 = vpop.permute.xlu0 %1088  ;;  %v1063_v43 = vpop.permute.xlu1 %1062 }
 0x384   :  { %v1099_v42 = vmul.f32 %v1777_v32, %v1089_v37  ;;  %1207 = vmatpush1.bf16.msra.mxu0 %v1148_v35  ;;  %v1074_v28 = vmul.f32 %v1773_v50, %v1063_v43  ;;  %v2019_v37 = vld [vmem:[#allocation7 + $0xc8] ss:$16 sps:$4 sm:$0xff]  }
 0x385   :  { %1208 = vmatprep.subr.bf16.mxu0 %v2136_v4 }
 0x386   :  { %v1147_v47 = vpack.c.bf16 %v1099_v42, %v1098_v38  ;;  %v2024_v38 = vld [vmem:[#allocation7 + $0xac] ss:$16 sps:$4 sm:$0xff]  }
 0x387   :  { %v1065_v2 = vpop.permute.xlu0 %1064  ;;  %v1049_v12 = vpop.permute.xlu1 %1048 }
 0x388   :  { %1209 = vmatpush1.bf16.msra.mxu0 %v1147_v47  ;;  %v1075_v51 = vmul.f32 %v1773_v50, %v1065_v2  ;;  %v1060_v54 = vmul.f32 %v1771_v34, %v1049_v12  ;;  %v2022_v12 = vld [vmem:[#allocation7 + $0xa8] ss:$16 sps:$4 sm:$0xff]  }
 0x389   :  { %1210 = vmatprep.subr.bf16.mxu0 %v2136_v4 }
 0x38a   :  { %v1145_v39 = vpack.c.bf16 %v1075_v51, %v1074_v28  ;;  %v2027_v51 = vld [vmem:[#allocation7 + $0x8c] ss:$16 sps:$4 sm:$0xff]  }
 0x38b   :  { %v1051_v0 = vpop.permute.xlu0 %1050  ;;  %v1035_v9 = vpop.permute.xlu1 %1034  ;;  %v2030_v28 = vld [vmem:[#allocation7 + $0x6c] ss:$16 sps:$4 sm:$0xff]  }
 0x38c   :  { %1211 = vmatpush1.bf16.msra.mxu0 %v1146_v48  ;;  %v1061_v40 = vmul.f32 %v1771_v34, %v1051_v0  ;;  %v1046_v58 = vmul.f32 %v1769_v55, %v1035_v9  ;;  %v2025_v0 = vld [vmem:[#allocation7 + $0x88] ss:$16 sps:$4 sm:$0xff]   ;;  %v2033_v9 = vld [vmem:[#allocation7 + $0x4c] ss:$16 sps:$4 sm:$0xff]  }
 0x38d   :  { %1212 = vmatprep.subr.bf16.mxu0 %v2136_v4  ;;  %v2028_v34 = vld [vmem:[#allocation7 + $0x68] ss:$16 sps:$4 sm:$0xff]  }
 0x38e   :  { %v1144_v56 = vpack.c.bf16 %v1061_v40, %v1060_v54  ;;  %v2036_v40 = vld [vmem:[#allocation7 + $0x2c] ss:$16 sps:$4 sm:$0xff]  }
 0x38f   :  { %v1037_v52 = vpop.permute.xlu0 %1036  ;;  %v1022_v11 = vpop.permute.xlu1 %1021  ;;  %v2039_v54 = vld [vmem:[#allocation7 + $0xc] ss:$16 sps:$4 sm:$0xff]  }
 0x390   :  { %1213 = vmatpush1.bf16.msra.mxu0 %v1145_v39  ;;  %v1047_v57 = vmul.f32 %v1769_v55, %v1037_v52  ;;  %v1032_v41 = vmul.f32 %v1767_v59, %v1022_v11  ;;  %v2031_v39 = vld [vmem:[#allocation7 + $0x48] ss:$16 sps:$4 sm:$0xff]  }
 0x391   :  { %1214 = vmatprep.subr.bf16.mxu0 %v2136_v4  ;;  %v2034_v52 = vld [vmem:[#allocation7 + $0x28] ss:$16 sps:$4 sm:$0xff]  }
 0x392   :  { %v1143_v60 = vpack.c.bf16 %v1047_v57, %v1046_v58  ;;  %v2037_v55 = vld [vmem:[#allocation7 + $0x8] ss:$16 sps:$4 sm:$0xff]  }
 0x393   :  { %v1024_v10 = vpop.permute.xlu0 %1023  ;;  %v1129_v48 = vpop.permute.xlu1 %1128 }
 0x394   :  { %1215 = vmatpush1.bf16.msra.mxu0 %v1144_v56  ;;  %v1033_v13 = vmul.f32 %v1767_v59, %v1024_v10  ;;  %v1140_v44 = vmul.f32 %v1783_v33, %v1129_v48 }
 0x395   :  { %1216 = vmatprep.subr.bf16.mxu0 %v2136_v4 }
 0x396   :  { %v1142_v49 = vpack.c.bf16 %v1033_v13, %v1032_v41 }
 0x397   :  { %v1131_v61 = vpop.permute.xlu0 %1130 }
 0x398   :  { %1217 = vmatpush1.bf16.msra.mxu0 %v1143_v60  ;;  %v1141_v31 = vmul.f32 %v1783_v33, %v1131_v61 }
 0x399   :  { %1218 = vmatprep.subr.bf16.mxu0 %v2136_v4 }
 0x39a   :  { %v1150_v45 = vpack.c.bf16 %v1141_v31, %v1140_v44 }
 0x39c   :  { %1219 = vmatpush1.bf16.msra.mxu0 %v1142_v49  ;;  %v1557_v49 = vld [vmem:[%s2726_s9] sm:$0x1] }
 0x39d   :  { %1234 = vmatprep.subr.bf16.mxu0 %v2136_v4 }
 0x3a0   :  { %1235 = vmatpush2.bf16.msra.mxu0 %v1150_v45  ;;  %v1162_v14 = vpop.permute.xlu1 %1161 }
 0x3a3   :  { %1237 = vmatmul.mubr.bf16.vlgmr.msra.gmra.mxu0 %v1988_v36 }
 0x3a4   :  { %1789 = vmatprep.mubr.msk.bf16.mxu0 %vm1197_vm10, %v1989_v46  ;;  %v1167_v17 = vpop.permute.xlu0 %1166  ;;  %v1172_v27 = vpop.permute.xlu1 %1171 }
 0x3a8   :  { %v1177_v32 = vpop.permute.xlu0 %1176 }
 0x3ab   :  { %1245 = vmatmul.mubr.bf16.gmra.mxu0 %v1991_v3 }
 0x3ac   :  { %1604 = vmatprep.mubr.bf16.mxu0 %v2136_v4 }
 0x463   :  { %v1238_v6 = vpop.f32.mrf.mxu0 }
 0x464   :  { %v1239_v16 = vadd.f32 %v1238_v6, %v1162_v14 }
 0x465   :  { %v1240_v15 = vpop.f32.mrf.mxu0 }
 0x466   :  { %v1253_v21 = vmax.f32 %v1239_v16, 0.0 }
 0x467   :  { %v1241_v18 = vpop.f32.mrf.mxu0 }
 0x468   :  { %v1242_v19 = vadd.f32 %v1241_v18, %v1167_v17  ;;  %v1567_v17 = vstv %s2727_s10 }
 0x469   :  { %v1243_v20 = vpop.f32.mrf.mxu0 }
 0x46a   :  { %v1254_v22 = vmax.f32 %v1242_v19, 0.0 }
 0x46b   :  { %v1246_v23 = vpop.f32.mrf.mxu0 }
 0x46c   :  { %v1257_v25 = vpack.c.bf16 %v1254_v22, %v1253_v21  ;;  %v1247_v30 = vadd.f32 %v1246_v23, %v1172_v27 }
 0x46d   :  { %v1248_v29 = vpop.f32.mrf.mxu0 }
 0x46e   :  { %1484 = vmatmul.mubr.bf16.vlgmr.msra.gmra.mxu1 %v1257_v25  ;;  %v1255_v47 = vmax.f32 %v1247_v30, 0.0 }
 0x46f   :  { %1505 = vmatpush1.bf16.msra.mxu1 %v2016_v24  ;;  %v1249_v35 = vpop.f32.mrf.mxu0  ;;  %1493 = vmatprep.mubr.bf16.mxu1 %v2136_v4 }
 0x470   :  { %v1250_v43 = vadd.f32 %v1249_v35, %v1177_v32  ;;  %1506 = vmatprep.subr.bf16.mxu1 %v2021_v26 }
 0x471   :  { %v1251_v42 = vpop.f32.mrf.mxu0 }
 0x472   :  { %v1256_v2 = vmax.f32 %v1250_v43, 0.0 }
 0x473   :  { %1507 = vmatpush1.bf16.msra.mxu1 %v2019_v37 }
 0x474   :  { %v1258_v50 = vpack.c.bf16 %v1256_v2, %v1255_v47  ;;  %1508 = vmatprep.subr.bf16.mxu1 %v2024_v38 }
 0x476   :  { %1494 = vmatmul.mubr.bf16.gmra.mxu1 %v1258_v50 }
 0x477   :  { %1509 = vmatpush1.bf16.msra.mxu1 %v2022_v12  ;;  %1536 = vmatprep.mubr.bf16.mxu1 %v2136_v4 }
 0x478   :  { %1510 = vmatprep.subr.bf16.mxu1 %v2027_v51 }
 0x47b   :  { %1511 = vmatpush1.bf16.msra.mxu1 %v2025_v0 }
 0x47c   :  { %1512 = vmatprep.subr.bf16.mxu1 %v2030_v28 }
 0x47f   :  { %1513 = vmatpush1.bf16.msra.mxu1 %v2028_v34 }
 0x480   :  { %1514 = vmatprep.subr.bf16.mxu1 %v2033_v9 }
 0x483   :  { %1515 = vmatpush1.bf16.msra.mxu1 %v2031_v39 }
 0x484   :  { %1516 = vmatprep.subr.bf16.mxu1 %v2036_v40 }
 0x487   :  { %1517 = vmatpush1.bf16.msra.mxu1 %v2034_v52 }
 0x488   :  { %1518 = vmatprep.subr.bf16.mxu1 %v2039_v54  ;;  %v2142_v54 = vmov 1966171168  }
 0x48b   :  { %1519 = vmatpush1.bf16.msra.mxu1 %v2037_v55  ;;  %v1697_v55 = vunpack.c.l.s4 %v2142_v54 }
 0x48e   :  { %1537 = vmatmul.mubr.bf16.vlgmr.msra.gmra.mxu1 %v1257_v25 }
 0x48f   :  { %1546 = vmatprep.mubr.bf16.mxu1 %v2136_v4 }
 0x496   :  { %1547 = vmatmul.mubr.bf16.gmra.mxu1 %v1258_v50 }
 0x52e   :  { %v1485_v56 = vpop.f32.mrf.mxu1 }
 0x530   :  { %v1487_v57 = vpop.f32.mrf.mxu1 }
 0x532   :  { %v1489_v11 = vpop.f32.mrf.mxu1 }
 0x533   :  { %v1558_v48 = vpack.c.bf16 %v1489_v11, %v1485_v56 }
 0x534   :  { %v1491_v10 = vpop.f32.mrf.mxu1 }
 0x535   :  { %v1559_v33 = vpack.c.bf16 %v1491_v10, %v1487_v57  ;;  %v1698_v10 = vunpack.c.0.s8 %v1697_v55 }
 0x536   :  { %v1495_v58 = vpop.f32.mrf.mxu1 }
 0x538   :  { %v1497_v59 = vpop.f32.mrf.mxu1 }
 0x53a   :  { %v1499_v60 = vpop.f32.mrf.mxu1 }
 0x53b   :  { %v1562_v41 = vpack.c.bf16 %v1499_v60, %v1495_v58 }
 0x53c   :  { %v1501_v13 = vpop.f32.mrf.mxu1 }
 0x53d   :  { %v1563_v61 = vpack.c.bf16 %v1501_v13, %v1497_v59 }
 0x53f   :  { %1584 = vmatprep.subr.bf16.mxu0 %v1563_v61 }
 0x540   :  { %1585 = vmatpush1.bf16.msra.mxu0 %v1562_v41 }
 0x541   :  { %1586 = vmatprep.subr.bf16.mxu0 %v1559_v33  ;;  %v1701_v33 = vsub.s32 %v1698_v10, %v2297_v8 }
 0x544   :  { %1587 = vmatpush1.bf16.msra.mxu0 %v1558_v48 }
 0x547   :  { %1822 = vmatmul.mubr.msk.bf16.vlgmr.msra.gmra.mxu0 %vm1568_vm11, %v1557_v49 }
 0x548   :  { %1645 = vmatprep.mubr.bf16.mxu0 %v2136_v4 }
 0x54e   :  { %v1538_v31 = vpop.f32.mrf.mxu1 }
 0x550   :  { %v1540_v44 = vpop.f32.mrf.mxu1 }
 0x552   :  { %v1542_v45 = vpop.f32.mrf.mxu1 }
 0x553   :  { %v1560_v6 = vpack.c.bf16 %v1542_v45, %v1538_v31 }
 0x554   :  { %v1544_v36 = vpop.f32.mrf.mxu1 }
 0x555   :  { %v1561_v5 = vpack.c.bf16 %v1544_v36, %v1540_v44 }
 0x556   :  { %v1548_v46 = vpop.f32.mrf.mxu1 }
 0x558   :  { %v1550_v3 = vpop.f32.mrf.mxu1 }
 0x55a   :  { %v1552_v1 = vpop.f32.mrf.mxu1 }
 0x55b   :  { %v1564_v63 = vpack.c.bf16 %v1552_v1, %v1548_v46 }
 0x55c   :  { %v1554_v53 = vpop.f32.mrf.mxu1 }
 0x55d   :  { %v1565_v62 = vpack.c.bf16 %v1554_v53, %v1550_v3 }
 0x55f   :  { %1625 = vmatprep.subr.bf16.mxu0 %v1565_v62 }
 0x560   :  { %1626 = vmatpush1.bf16.msra.mxu0 %v1564_v63 }
 0x561   :  { %1627 = vmatprep.subr.bf16.mxu0 %v1561_v5 }
 0x564   :  { %1628 = vmatpush1.bf16.msra.mxu0 %v1560_v6 }
 0x567   :  { %1823 = vmatmul.mubr.msk.bf16.vlgmr.msra.gmra.mxu0 %vm1568_vm11, %v1557_v49 }
 0x607   :  { %v1606_v14 = vpop.f32.mrf.mxu0 }
 0x608   :  { %v1607_v19 = vadd.f32 %v1606_v14, %v1567_v17 }
 0x609   :  { %v1608_v4 = vpop.f32.mrf.mxu0 }
 0x60a   :  { %v1609_v18 = vadd.f32 %v1608_v4, %v1567_v17  ;;  %v1654_v21 = vand.u32 2147483647, %v1607_v19  ;;  %vm1678_vm13 = vcmp.ge.f32.partialorder %v1607_v19, 0.0 }
 0x60b   :  { %v1610_v15 = vpop.f32.mrf.mxu0 }
 0x60c   :  { %v1655_v20 = vand.u32 2147483647, %v1609_v18  ;;  %v1658_v23 = vsub.f32 0.0, %v1654_v21  ;;  %vm1679_vm12 = vcmp.ge.f32.partialorder %v1609_v18, 0.0 }
 0x60d   :  { %v1611_v16 = vpop.f32.mrf.mxu0 }
 0x60e   :  { %v1659_v22 = vsub.f32 0.0, %v1655_v20  ;;  %v1662_v25 = vmul.f32 1.442695, %v1658_v23 }
 0x610   :  { %v1664_v24 = vmul.f32 1.442695, %v1659_v22 }
 0x612   :  { %2040 = vpow2.f32 %v1664_v24 }
 0x613   :  { %2042 = vpow2.f32 %v1662_v25 }
 0x61f   :  { %v2041_v12 = vpop.eup %2040 }
 0x620   :  { %v2043_v50 = vpop.eup %2042  ;;  %v1671_v51 = vadd.f32 1.0, %v2041_v12 }
 0x621   :  { %v1670_v0 = vadd.f32 1.0, %v2043_v50 }
 0x627   :  { %v1647_v26 = vpop.f32.mrf.mxu0 }
 0x628   :  { %v1648_v27 = vadd.f32 %v1647_v26, %v1567_v17 }
 0x629   :  { %v1649_v29 = vpop.f32.mrf.mxu0 }
 0x62a   :  { %v1656_v30 = vand.u32 2147483647, %v1648_v27  ;;  %v1650_v32 = vadd.f32 %v1649_v29, %v1567_v17  ;;  %vm1680_vm14 = vcmp.ge.f32.partialorder %v1648_v27, 0.0 }
 0x62b   :  { %v1651_v35 = vpop.f32.mrf.mxu0 }
 0x62c   :  { %v1660_v37 = vsub.f32 0.0, %v1656_v30  ;;  %v1657_v43 = vand.u32 2147483647, %v1650_v32  ;;  %vm1681_vm15 = vcmp.ge.f32.partialorder %v1650_v32, 0.0 }
 0x62d   :  { %v1652_v38 = vpop.f32.mrf.mxu0 }
 0x62e   :  { %v1666_v42 = vmul.f32 1.442695, %v1660_v37  ;;  %v1661_v47 = vsub.f32 0.0, %v1657_v43 }
 0x630   :  { %2044 = vpow2.f32 %v1666_v42  ;;  %v1668_v2 = vmul.f32 1.442695, %v1661_v47 }
 0x632   :  { %2046 = vpow2.f32 %v1668_v2 }
 0x633   :  { %2048 = vrcp.f32 %v1671_v51 }
 0x634   :  { %2050 = vrcp.f32 %v1670_v0 }
 0x63d   :  { %v2045_v28 = vpop.eup %2044 }
 0x63e   :  { %v1672_v34 = vadd.f32 1.0, %v2045_v28 }
 0x63f   :  { %v2047_v9 = vpop.eup %2046 }
 0x640   :  { %2052 = vrcp.f32 %v1672_v34  ;;  %v1673_v39 = vadd.f32 1.0, %v2047_v9  ;;  %v2049_v40 = vpop.eup %2048 }
 0x641   :  { %v2051_v52 = vpop.eup %2050  ;;  %v1683_v56 = vmul.f32 %v2049_v40, %v2041_v12 }
 0x642   :  { %2054 = vrcp.f32 %v1673_v39  ;;  %v1682_v57 = vmul.f32 %v2051_v52, %v2043_v50 }
 0x643   :  { %v1687_v58 = vsel %vm1679_vm12, %v2049_v40, %v1683_v56 }
 0x644   :  { %v1686_v13 = vsel %vm1678_vm13, %v2051_v52, %v1682_v57 }
 0x645   :  { %v1694_v41 = vcombine.low %v1686_v13, %v1687_v58 }
 0x647   :  { %v1702_v44 = vrot.slane %v1694_v41, %v1701_v33 }
 0x64d   :  { %v2053_v11 = vpop.eup %2052 }
 0x64e   :  { %v1684_v59 = vmul.f32 %v2053_v11, %v2045_v28 }
 0x64f   :  { %v2055_v60 = vpop.eup %2054 }
 0x650   :  { %v1685_v61 = vmul.f32 %v2055_v60, %v2047_v9  ;;  %v1688_v48 = vsel %vm1680_vm14, %v2053_v11, %v1684_v59 }
 0x652   :  { %v1689_v49 = vsel %vm1681_vm15, %v2055_v60, %v1685_v61 }
 0x653   :  { %v1695_v31 = vcombine.low %v1688_v48, %v1689_v49 }
 0x655   :  { %v1709_v45 = vrot.slane %v1695_v31, %v1701_v33 }
 0x657   :  { %v1710_v36 = vcombine.low %v1702_v44, %v1709_v45 }
 0x659   :  { %v1717_v46 = vrot.slane %v1710_v36, %v1701_v33 }
 0x65b   :  { %1723 = vst.msk [vmem:[%s2728_s11] sm:$0xf] %vm1721_vm0, %v1717_v46 }
 0x65c   :  { %1728 = vsyncpa [#allocation4], 1 }
 0x65d   :  { %1729 = vsyncpa [#allocation6], 1 }

</bundles_post_ra>
